<compile_context>
chip_gen: v7x
topology: tpu7x:2x2x1
jax: 0.10.0
libtpu: 0.0.40
codegen_flags: <defaults>
</compile_context>

<pallas_src>
import math
import numpy as np
import jax
import jax.numpy as jnp
from jax.experimental import pallas as pl
from jax.experimental.pallas import tpu as pltpu

# ----------------------- static model configuration -----------------------
PATCH = 2                          # patch_size
H_IMG = 4
W_IMG = 4
SAMPLE = H_IMG * W_IMG             # sample_size == d_model of positional enc = 16
HEADS = 16                         # head_num (module default)
NUM_CLASSES = 16                   # num_classes (module default)
DIM = PATCH * SAMPLE               # patch_feature_dim = 32
DIM_HEAD = DIM // (HEADS // 4)     # 8
INNER = HEADS * DIM_HEAD           # 128
MLP_DIM = DIM * 2                  # 64
DIN = PATCH * H_IMG * W_IMG        # 32 (== sample_size * patch_size)
LN_EPS = 1e-5
ATTN_SCALE = DIM_HEAD ** -0.5
R_TARGET = 128                     # target token rows per grid step
NEG_INF = -1e30

# row indices of the packed (8, DIM) bias / LayerNorm parameter slab (== wrapper order)
(V_LN1_G, V_LN1_B, V_B_O, V_LN2_G, V_LN2_B, V_B_FF2, V_LNH_G, V_LNH_B) = range(8)


# ----------------------------- shared helpers ------------------------------
def _erf(x):
    # Abramowitz & Stegun 7.1.26 polynomial (|err| < 1.5e-7); exp + arithmetic only.
    a1, a2, a3, a4, a5 = 0.254829592, -0.284496736, 1.421413741, -1.453152027, 1.061405429
    p = 0.3275911
    ax = jnp.abs(x)
    t = 1.0 / (1.0 + p * ax)
    poly = ((((a5 * t + a4) * t + a3) * t + a2) * t + a1) * t
    y = 1.0 - poly * jnp.exp(-ax * ax)
    return jnp.where(x >= 0.0, y, -y)


def _gelu_exact(x):
    # matches torch.nn.GELU() (erf based, approximate='none') up to the erf tolerance
    return 0.5 * x * (1.0 + _erf(x * (1.0 / math.sqrt(2.0))))


def _layernorm(x, gamma, beta):
    mu = jnp.mean(x, axis=-1, keepdims=True)
    var = jnp.mean((x - mu) ** 2, axis=-1, keepdims=True)
    return (x - mu) * jax.lax.rsqrt(var + LN_EPS) * gamma + beta


# --------------------------------- kernel ----------------------------------
def _make_kernel(n_tok):
    inv_tok = 1.0 / float(n_tok)

    def kernel(x_ref, posb_ref, rowc_ref, rowr_ref, vecs_ref,
               w_emb_ref, w_qkv_ref, w_o_ref, w_ff1_ref, b_ff1_ref,
               w_ff2_ref, w_head_ref, b_head_ref,
               out_ref, qkv_scr, ao_scr):
        rows = x_ref.shape[0]
        bb = out_ref.shape[0]

        def vec(r):
            return vecs_ref[r:r + 1, :]                                # (1, DIM) f32

        # ---- patch embedding (positional enc + bias pre-folded into posb) ----
        x_bf = x_ref[...].astype(jnp.bfloat16)
        tok = jnp.dot(x_bf, w_emb_ref[...],
                      preferred_element_type=jnp.float32) + posb_ref[...]   # (rows, DIM) f32

        # ---- multi-head self-attention (PreNorm), fused + pre-scaled qkv ----
        xn = _layernorm(tok, vec(V_LN1_G), vec(V_LN1_B))
        qkv = jnp.dot(xn.astype(jnp.bfloat16), w_qkv_ref[...],
                      preferred_element_type=jnp.float32)              # (rows, 3*INNER) f32
        qkv_scr[...] = qkv.astype(jnp.bfloat16)                        # stage in VMEM, re-slice per head

        # block-diagonal additive mask built in-kernel (0 within a batch element, -1e30 across)
        neg_bias = jnp.where(rowc_ref[...] == rowr_ref[...], 0.0, NEG_INF).astype(jnp.bfloat16)

        for hd in range(HEADS):
            s = hd * DIM_HEAD
            qh = qkv_scr[:, s:s + DIM_HEAD]                            # (rows, dh) bf16, pre-scaled
            kh = qkv_scr[:, INNER + s:INNER + s + DIM_HEAD]
            vh = qkv_scr[:, 2 * INNER + s:2 * INNER + s + DIM_HEAD]
            dots = jax.lax.dot_general(qh, kh, (((1,), (1,)), ((), ())),
                                       preferred_element_type=jnp.float32)  # (rows, rows) f32
            dots = dots + neg_bias
            m = jnp.max(dots, axis=-1, keepdims=True)                  # in-block max (diag unmasked)
            p = jnp.exp(dots - m)                                      # masked entries -> exp(-1e30) == 0
            denom = jnp.sum(p, axis=-1, keepdims=True)
            o = jnp.dot(p.astype(jnp.bfloat16), vh, preferred_element_type=jnp.float32)
            o = o * pl.reciprocal(denom, approx=True)                  # deferred softmax normalization
            ao_scr[:, s:s + DIM_HEAD] = o.astype(jnp.bfloat16)

        x2 = jnp.dot(ao_scr[...], w_o_ref[...],
                     preferred_element_type=jnp.float32) + vec(V_B_O) + tok   # residual

        # ---- feed-forward (PreNorm) ----
        yn = _layernorm(x2, vec(V_LN2_G), vec(V_LN2_B))
        hdn = _gelu_exact(jnp.dot(yn.astype(jnp.bfloat16), w_ff1_ref[...],
                                  preferred_element_type=jnp.float32) + b_ff1_ref[...])
        x3 = jnp.dot(hdn.astype(jnp.bfloat16), w_ff2_ref[...],
                     preferred_element_type=jnp.float32) + vec(V_B_FF2) + x2  # residual

        # ---- mean pool over tokens (selection matmul built in-kernel) + mlp head ----
        sel = jax.lax.broadcasted_iota(jnp.int32, (bb, rows), 0) == rowr_ref[...]
        pool = sel.astype(jnp.float32) * inv_tok                       # (bb, rows)
        pooled = jnp.dot(pool, x3, preferred_element_type=jnp.float32)  # (bb, DIM) f32
        pn = _layernorm(pooled, vec(V_LNH_G), vec(V_LNH_B))
        out_ref[...] = jnp.dot(pn.astype(jnp.bfloat16), w_head_ref[...],
                               preferred_element_type=jnp.float32) + b_head_ref[...]

    return kernel


# --------------------------- parameters / buffers ---------------------------
def init_params(key):
    ks = jax.random.split(key, 6)

    def w(k, shape, fan_in):
        return (jax.random.normal(k, shape, jnp.float32) / np.sqrt(fan_in)).astype(jnp.float32)

    p = {}
    p["w_emb"] = w(ks[0], (DIN, DIM), DIN)
    p["b_emb"] = jnp.zeros((1, DIM), jnp.float32)
    p["ln1_g"] = jnp.ones((1, DIM), jnp.float32)
    p["ln1_b"] = jnp.zeros((1, DIM), jnp.float32)
    p["w_qkv"] = w(ks[1], (DIM, 3 * INNER), DIM)     # fused [q | k | v], bias-free
    p["w_o"] = w(ks[2], (INNER, DIM), INNER)
    p["b_o"] = jnp.zeros((1, DIM), jnp.float32)
    p["ln2_g"] = jnp.ones((1, DIM), jnp.float32)
    p["ln2_b"] = jnp.zeros((1, DIM), jnp.float32)
    p["w_ff1"] = w(ks[3], (DIM, MLP_DIM), DIM)
    p["b_ff1"] = jnp.zeros((1, MLP_DIM), jnp.float32)
    p["w_ff2"] = w(ks[4], (MLP_DIM, DIM), MLP_DIM)
    p["b_ff2"] = jnp.zeros((1, DIM), jnp.float32)
    p["lnh_g"] = jnp.ones((1, DIM), jnp.float32)
    p["lnh_b"] = jnp.zeros((1, DIM), jnp.float32)
    p["w_head"] = w(ks[5], (DIM, NUM_CLASSES), DIM)
    p["b_head"] = jnp.zeros((1, NUM_CLASSES), jnp.float32)
    return p


def build_pos_bias(c):
    """GaussEncoding buffer: pe[:c, 0, :] * gauss_kernel -> (c, sample_size)."""
    d_model = SAMPLE
    max_len = 300
    position = np.arange(max_len, dtype=np.float32)[:, None]
    div_term = np.exp(np.arange(0, d_model, 2, dtype=np.float32) * (-math.log(10000.0) / d_model))
    pe = np.zeros((max_len, d_model), np.float32)
    pe[:, 0::2] = np.sin(position * div_term)
    pe[:, 1::2] = np.cos(position * div_term)      # d_model is even here
    ksz = int(np.sqrt(d_model))
    sigma = int(ksz / 2)
    center = ksz // 2
    s = sigma ** 2
    gk = np.zeros((ksz, ksz), np.float64)
    for i in range(ksz):
        for j in range(ksz):
            gk[i, j] = np.exp(-(((i - center) ** 2 + (j - center) ** 2) / (2.0 * s)))
    gk = gk.reshape((-1, d_model)).astype(np.float32)   # (1, d_model)
    return jnp.asarray(pe[:c, :] * gk, jnp.float32)     # (c, d_model)


# --------------------------------- wrapper ----------------------------------
def _pick_bb(b, n_tok):
    """Batch elements per grid step: rows = bb*n_tok ~ R_TARGET; 8-row-aligned blocks whenever
    the grid has more than one step (Pallas (8,128) block constraint); >=2 steps when possible
    so v7x's two TensorCores both get work."""
    bb = max(1, min(b, max(1, R_TARGET // n_tok)))
    if bb < b:
        bb8 = (bb // 8) * 8
        bb = bb8 if bb8 >= 8 else b            # fall back to a single step for awkward shapes
    b_pad = ((b + bb - 1) // bb) * bb
    if b_pad // bb < 2 and bb >= 16 and (bb // 2) % 8 == 0:
        bb //= 2                               # split for the second TensorCore (v7x)
        b_pad = ((b + bb - 1) // bb) * bb
    return bb, b_pad


def spectral_attention_forward(x, params):
    """Forward pass of `spectral_attention` (inference: dropout = identity). x: (b, C, h, w) f32."""
    b, C, h, w = x.shape
    assert h == H_IMG and w == W_IMG, "kernel is specialized to 4x4 spatial maps (sample_size=16)"

    # F.pad(..., (0,0,0,0,0,add), mode='replicate') on the channel dim.
    # NOTE: matches torch exactly -- if C % PATCH == 0 it still pads PATCH channels.
    add = PATCH - C % PATCH
    xp = jnp.pad(x.astype(jnp.float32), ((0, 0), (0, add), (0, 0), (0, 0)), mode="edge")
    c = C + add
    n_tok = c // PATCH
    din = PATCH * h * w

    bb, b_pad = _pick_bb(b, n_tok)
    rows = bb * n_tok

    # 'b 1 (c_num c_patch) h w -> b 1 c_num (c_patch h w)' is a contiguous reshape.
    tokens = xp.reshape(b, n_tok, din)
    if b_pad != b:
        tokens = jnp.pad(tokens, ((0, b_pad - b), (0, 0), (0, 0)))
    tokens_flat = tokens.reshape(b_pad * n_tok, din)

    # Fold positional encoding + embed bias into one per-row bias: (x+p)W + b = xW + (pW + b).
    pos_tok = build_pos_bias(c).reshape(n_tok, din)                     # (n_tok, Din)
    pos_emb_bias = pos_tok @ params["w_emb"] + params["b_emb"]          # (n_tok, DIM) f32
    posb_tiled = jnp.tile(pos_emb_bias, (bb, 1))                        # (rows, DIM)

    # Tiny row -> batch-element id vectors; the kernel builds the block-diagonal attention
    # mask and the mean-pool selection from these (no (R,R)/(BB,R) operands in HBM).
    rowid = np.arange(rows, dtype=np.int32) // n_tok
    rowid_col = jnp.asarray(rowid.reshape(rows, 1))
    rowid_row = jnp.asarray(rowid.reshape(1, rows))

    # Pack the (1, DIM) bias / LayerNorm vectors into one slab (row order == V_* constants).
    vecs = jnp.concatenate(
        [params[k] for k in ("ln1_g", "ln1_b", "b_o", "ln2_g", "ln2_b",
                             "b_ff2", "lnh_g", "lnh_b")], axis=0)        # (8, DIM)

    # bf16 weights for the MXU; attention scale folded into the q columns of the fused qkv weight.
    w_qkv_scaled = params["w_qkv"].at[:, :INNER].multiply(ATTN_SCALE)
    w_emb = params["w_emb"].astype(jnp.bfloat16)
    w_qkv = w_qkv_scaled.astype(jnp.bfloat16)
    w_o = params["w_o"].astype(jnp.bfloat16)
    w_ff1 = params["w_ff1"].astype(jnp.bfloat16)
    w_ff2 = params["w_ff2"].astype(jnp.bfloat16)
    w_head = params["w_head"].astype(jnp.bfloat16)

    def full_spec(a):
        return pl.BlockSpec(a.shape, lambda i, _n=a.ndim: (0,) * _n)

    in_specs = [pl.BlockSpec((rows, din), lambda i: (i, 0)),
                full_spec(posb_tiled), full_spec(rowid_col), full_spec(rowid_row),
                full_spec(vecs),
                full_spec(w_emb), full_spec(w_qkv), full_spec(w_o),
                full_spec(w_ff1), full_spec(params["b_ff1"]), full_spec(w_ff2),
                full_spec(w_head), full_spec(params["b_head"])]

    out = pl.pallas_call(
        _make_kernel(n_tok),
        out_shape=jax.ShapeDtypeStruct((b_pad, NUM_CLASSES), jnp.float32),
        grid_spec=pltpu.PrefetchScalarGridSpec(
            num_scalar_prefetch=0,
            grid=(b_pad // bb,),
            in_specs=in_specs,
            out_specs=pl.BlockSpec((bb, NUM_CLASSES), lambda i: (i, 0)),
            scratch_shapes=[pltpu.VMEM((rows, 3 * INNER), jnp.bfloat16),   # bf16 qkv slab
                            pltpu.VMEM((rows, INNER), jnp.bfloat16)],      # per-head outputs
        ),
        compiler_params=pltpu.CompilerParams(dimension_semantics=("parallel",)),
    )(tokens_flat, posb_tiled, rowid_col, rowid_row, vecs,
      w_emb, w_qkv, w_o, w_ff1, params["b_ff1"], w_ff2, w_head, params["b_head"])

    return out[:b]


# ------------------------ pure-JAX f32 reference -----------------------------
def spectral_attention_ref(x, params):
    b, C, h, w = x.shape
    add = PATCH - C % PATCH
    xp = jnp.pad(x.astype(jnp.float32), ((0, 0), (0, add), (0, 0), (0, 0)), mode="edge")
    c = C + add
    n_tok = c // PATCH
    din = PATCH * h * w
    tokens = xp.reshape(b, n_tok, din) + build_pos_bias(c).reshape(n_tok, din)[None]
    tok = tokens @ params["w_emb"] + params["b_emb"]
    xn = _layernorm(tok, params["ln1_g"], params["ln1_b"])
    qkv = xn @ params["w_qkv"]
    q, k, v = (qkv[..., i * INNER:(i + 1) * INNER] for i in range(3))

    def heads(t):
        return t.reshape(b, n_tok, HEADS, DIM_HEAD).transpose(0, 2, 1, 3)

    qh, kh, vh = heads(q), heads(k), heads(v)
    dots = jnp.einsum("bhid,bhjd->bhij", qh, kh) * ATTN_SCALE
    attn = jax.nn.softmax(dots, axis=-1)
    ao = jnp.einsum("bhij,bhjd->bhid", attn, vh).transpose(0, 2, 1, 3).reshape(b, n_tok, INNER)
    x2 = ao @ params["w_o"] + params["b_o"] + tok
    yn = _layernorm(x2, params["ln2_g"], params["ln2_b"])
    hdn = jax.nn.gelu(yn @ params["w_ff1"] + params["b_ff1"], approximate=False)
    x3 = hdn @ params["w_ff2"] + params["b_ff2"] + x2
    pooled = x3.mean(axis=1)
    pn = _layernorm(pooled, params["lnh_g"], params["lnh_b"])
    return pn @ params["w_head"] + params["b_head"]


# ----------------------------------- main ------------------------------------
if __name__ == "__main__":
    key = jax.random.PRNGKey(0)
    kx, kp = jax.random.split(key)

    # batch=2, C=7 spectral channels (replicate-padded to 8 -> 4 tokens), 4x4 spatial
    x = jax.random.normal(kx, (2, 7, H_IMG, W_IMG), jnp.float32)
    params = init_params(kp)

    y = spectral_attention_forward(x, params)
    jax.block_until_ready(y)

    y_ref = spectral_attention_ref(x, params)
    err = float(jnp.max(jnp.abs(y - y_ref)))

    assert y.shape == (2, NUM_CLASSES)
    assert bool(jnp.all(jnp.isfinite(y)))
    assert err < 0.35, f"kernel vs f32 reference mismatch: max|diff|={err}"   # bf16 tolerance
    print("KERNEL_OK")
</pallas_src>

<mosaic_0001>
module attributes {stable_mosaic.version = 11 : i64} {
  func.func @kernel(%arg0: i32, %arg1: memref<8x32xf32, #tpu.memory_space<vmem>>, %arg2: memref<8x32xf32, #tpu.memory_space<vmem>>, %arg3: memref<8x1xi32, #tpu.memory_space<vmem>>, %arg4: memref<1x8xi32, #tpu.memory_space<vmem>>, %arg5: memref<8x32xf32, #tpu.memory_space<vmem>>, %arg6: memref<32x32xbf16, #tpu.memory_space<vmem>>, %arg7: memref<32x384xbf16, #tpu.memory_space<vmem>>, %arg8: memref<128x32xbf16, #tpu.memory_space<vmem>>, %arg9: memref<32x64xbf16, #tpu.memory_space<vmem>>, %arg10: memref<1x64xf32, #tpu.memory_space<vmem>>, %arg11: memref<64x32xbf16, #tpu.memory_space<vmem>>, %arg12: memref<32x16xbf16, #tpu.memory_space<vmem>>, %arg13: memref<1x16xf32, #tpu.memory_space<vmem>>, %arg14: memref<2x16xf32, #tpu.memory_space<vmem>>, %arg15: memref<8x384xbf16, #tpu.memory_space<vmem>>, %arg16: memref<8x128xbf16, #tpu.memory_space<vmem>>) attributes {dimension_semantics = [#tpu.dimension_semantics<parallel>], iteration_bounds = array<i64: 1>, scalar_prefetch = 0 : i64, scratch_operands = 2 : i64, tpu.core_type = #tpu.core_type<tc>, window_params = [{transform_indices = @transform_0, window_bounds = array<i64: 8, 32>}, {pipeline_mode = #tpu.pipeline_mode<synchronous>, transform_indices = @transform_1, window_bounds = array<i64: 8, 32>}, {pipeline_mode = #tpu.pipeline_mode<synchronous>, transform_indices = @transform_2, window_bounds = array<i64: 8, 1>}, {pipeline_mode = #tpu.pipeline_mode<synchronous>, transform_indices = @transform_3, window_bounds = array<i64: 1, 8>}, {pipeline_mode = #tpu.pipeline_mode<synchronous>, transform_indices = @transform_4, window_bounds = array<i64: 8, 32>}, {pipeline_mode = #tpu.pipeline_mode<synchronous>, transform_indices = @transform_5, window_bounds = array<i64: 32, 32>}, {pipeline_mode = #tpu.pipeline_mode<synchronous>, transform_indices = @transform_6, window_bounds = array<i64: 32, 384>}, {pipeline_mode = #tpu.pipeline_mode<synchronous>, transform_indices = @transform_7, window_bounds = array<i64: 128, 32>}, {pipeline_mode = #tpu.pipeline_mode<synchronous>, transform_indices = @transform_8, window_bounds = array<i64: 32, 64>}, {pipeline_mode = #tpu.pipeline_mode<synchronous>, transform_indices = @transform_9, window_bounds = array<i64: 1, 64>}, {pipeline_mode = #tpu.pipeline_mode<synchronous>, transform_indices = @transform_10, window_bounds = array<i64: 64, 32>}, {pipeline_mode = #tpu.pipeline_mode<synchronous>, transform_indices = @transform_11, window_bounds = array<i64: 32, 16>}, {pipeline_mode = #tpu.pipeline_mode<synchronous>, transform_indices = @transform_12, window_bounds = array<i64: 1, 16>}, {transform_indices = @transform_13, window_bounds = array<i64: 2, 16>}]} {
    %c0 = arith.constant 0 : index
    %c0_0 = arith.constant 0 : index
    %0 = vector.load %arg1[%c0, %c0_0] : memref<8x32xf32, #tpu.memory_space<vmem>>, vector<8x32xf32>
    %1 = arith.truncf %0 : vector<8x32xf32> to vector<8x32xbf16>
    %c0_1 = arith.constant 0 : index
    %c0_2 = arith.constant 0 : index
    %2 = vector.load %arg6[%c0_1, %c0_2] : memref<32x32xbf16, #tpu.memory_space<vmem>>, vector<32x32xbf16>
    %cst = arith.constant dense<0.000000e+00> : vector<8x32xf32>
    %3 = tpu.matmul %1, %2, %cst {dimension_numbers = #tpu.dot_dimension_numbers<[1], [0], [0], [1], [0, 0, 1, 1], [], []>} : vector<8x32xbf16>, vector<32x32xbf16>, vector<8x32xf32> -> vector<8x32xf32>
    %c0_3 = arith.constant 0 : index
    %c0_4 = arith.constant 0 : index
    %4 = vector.load %arg2[%c0_3, %c0_4] : memref<8x32xf32, #tpu.memory_space<vmem>>, vector<8x32xf32>
    %5 = arith.addf %3, %4 : vector<8x32xf32>
    %c0_5 = arith.constant 0 : index
    %c0_6 = arith.constant 0 : index
    %6 = vector.load %arg5[%c0_5, %c0_6] : memref<8x32xf32, #tpu.memory_space<vmem>>, vector<1x32xf32>
    %c1 = arith.constant 1 : index
    %c0_7 = arith.constant 0 : index
    %7 = vector.load %arg5[%c1, %c0_7] : memref<8x32xf32, #tpu.memory_space<vmem>>, vector<1x32xf32>
    %cst_8 = arith.constant dense<0.000000e+00> : vector<8xf32>
    %8 = vector.multi_reduction <add>, %5, %cst_8 [1] : vector<8x32xf32> to vector<8xf32>
    %9 = vector.shape_cast %8 : vector<8xf32> to vector<8x1xf32>
    %cst_9 = arith.constant 3.200000e+01 : f32
    %10 = vector.broadcast %cst_9 : f32 to vector<8x1xf32>
    %11 = arith.divf %9, %10 : vector<8x1xf32>
    %12 = vector.broadcast %11 : vector<8x1xf32> to vector<8x32xf32>
    %13 = arith.subf %5, %12 : vector<8x32xf32>
    %14 = arith.mulf %13, %13 : vector<8x32xf32>
    %cst_10 = arith.constant dense<0.000000e+00> : vector<8xf32>
    %15 = vector.multi_reduction <add>, %14, %cst_10 [1] : vector<8x32xf32> to vector<8xf32>
    %16 = vector.shape_cast %15 : vector<8xf32> to vector<8x1xf32>
    %cst_11 = arith.constant 3.200000e+01 : f32
    %17 = vector.broadcast %cst_11 : f32 to vector<8x1xf32>
    %18 = arith.divf %16, %17 : vector<8x1xf32>
    %19 = vector.broadcast %11 : vector<8x1xf32> to vector<8x32xf32>
    %20 = arith.subf %5, %19 : vector<8x32xf32>
    %cst_12 = arith.constant 9.99999974E-6 : f32
    %21 = vector.broadcast %cst_12 : f32 to vector<8x1xf32>
    %22 = arith.addf %18, %21 : vector<8x1xf32>
    %23 = math.rsqrt %22 : vector<8x1xf32>
    %24 = vector.broadcast %23 : vector<8x1xf32> to vector<8x32xf32>
    %25 = arith.mulf %20, %24 : vector<8x32xf32>
    %26 = vector.broadcast %6 : vector<1x32xf32> to vector<8x32xf32>
    %27 = arith.mulf %25, %26 : vector<8x32xf32>
    %28 = vector.broadcast %7 : vector<1x32xf32> to vector<8x32xf32>
    %29 = arith.addf %27, %28 : vector<8x32xf32>
    %30 = arith.truncf %29 : vector<8x32xf32> to vector<8x32xbf16>
    %c0_13 = arith.constant 0 : index
    %c0_14 = arith.constant 0 : index
    %31 = vector.load %arg7[%c0_13, %c0_14] : memref<32x384xbf16, #tpu.memory_space<vmem>>, vector<32x384xbf16>
    %cst_15 = arith.constant dense<0.000000e+00> : vector<8x384xf32>
    %32 = tpu.matmul %30, %31, %cst_15 {dimension_numbers = #tpu.dot_dimension_numbers<[1], [0], [0], [1], [0, 0, 1, 1], [], []>} : vector<8x32xbf16>, vector<32x384xbf16>, vector<8x384xf32> -> vector<8x384xf32>
    %33 = arith.truncf %32 : vector<8x384xf32> to vector<8x384xbf16>
    %c0_16 = arith.constant 0 : index
    %c0_17 = arith.constant 0 : index
    %34 = vector.load %arg15[%c0_16, %c0_17] : memref<8x384xbf16, #tpu.memory_space<vmem>>, vector<8x384xbf16>
    tpu.vector_store %arg15[%c0_16, %c0_17], %33 {strides = array<i32>} : memref<8x384xbf16, #tpu.memory_space<vmem>>, vector<8x384xbf16>,
    %c0_18 = arith.constant 0 : index
    %c0_19 = arith.constant 0 : index
    %35 = vector.load %arg3[%c0_18, %c0_19] : memref<8x1xi32, #tpu.memory_space<vmem>>, vector<8x1xi32>
    %c0_20 = arith.constant 0 : index
    %c0_21 = arith.constant 0 : index
    %36 = vector.load %arg4[%c0_20, %c0_21] : memref<1x8xi32, #tpu.memory_space<vmem>>, vector<1x8xi32>
    %37 = vector.broadcast %35 : vector<8x1xi32> to vector<8x8xi32>
    %38 = vector.broadcast %36 : vector<1x8xi32> to vector<8x8xi32>
    %39 = arith.cmpi eq, %37, %38 : vector<8x8xi32>
    %cst_22 = arith.constant 0.000000e+00 : f32
    %cst_23 = arith.constant -1.000000e+30 : f32
    %40 = vector.broadcast %cst_22 : f32 to vector<8x8xf32>
    %41 = vector.broadcast %cst_23 : f32 to vector<8x8xf32>
    %42 = arith.select %39, %40, %41 : vector<8x8xi1>, vector<8x8xf32>
    %43 = arith.truncf %42 : vector<8x8xf32> to vector<8x8xbf16>
    %c0_24 = arith.constant 0 : index
    %c0_25 = arith.constant 0 : index
    %44 = vector.load %arg15[%c0_24, %c0_25] : memref<8x384xbf16, #tpu.memory_space<vmem>>, vector<8x8xbf16>
    %c0_26 = arith.constant 0 : index
    %c128 = arith.constant 128 : index
    %45 = vector.load %arg15[%c0_26, %c128] : memref<8x384xbf16, #tpu.memory_space<vmem>>, vector<8x8xbf16>
    %c0_27 = arith.constant 0 : index
    %c256 = arith.constant 256 : index
    %46 = vector.load %arg15[%c0_27, %c256] : memref<8x384xbf16, #tpu.memory_space<vmem>>, vector<8x8xbf16>
    %cst_28 = arith.constant dense<0.000000e+00> : vector<8x8xf32>
    %47 = tpu.matmul %44, %45, %cst_28 {dimension_numbers = #tpu.dot_dimension_numbers<[1], [1], [0], [0], [0, 0, 1, 0], [], []>} : vector<8x8xbf16>, vector<8x8xbf16>, vector<8x8xf32> -> vector<8x8xf32>
    %48 = arith.extf %43 : vector<8x8xbf16> to vector<8x8xf32>
    %49 = arith.addf %47, %48 : vector<8x8xf32>
    %cst_29 = arith.constant dense<0xFF800000> : vector<8xf32>
    %50 = vector.multi_reduction <maximumf>, %49, %cst_29 [1] : vector<8x8xf32> to vector<8xf32>
    %51 = vector.shape_cast %50 : vector<8xf32> to vector<8x1xf32>
    %52 = vector.broadcast %51 : vector<8x1xf32> to vector<8x8xf32>
    %53 = arith.subf %49, %52 : vector<8x8xf32>
    %54 = math.exp %53 : vector<8x8xf32>
    %cst_30 = arith.constant dense<0.000000e+00> : vector<8xf32>
    %55 = vector.multi_reduction <add>, %54, %cst_30 [1] : vector<8x8xf32> to vector<8xf32>
    %56 = vector.shape_cast %55 : vector<8xf32> to vector<8x1xf32>
    %57 = arith.truncf %54 : vector<8x8xf32> to vector<8x8xbf16>
    %cst_31 = arith.constant dense<0.000000e+00> : vector<8x8xf32>
    %58 = tpu.matmul %57, %46, %cst_31 {dimension_numbers = #tpu.dot_dimension_numbers<[1], [0], [0], [1], [0, 0, 1, 1], [], []>} : vector<8x8xbf16>, vector<8x8xbf16>, vector<8x8xf32> -> vector<8x8xf32>
    %59 = tpu.reciprocal %56 {approx = true} : vector<8x1xf32> -> vector<8x1xf32>
    %60 = vector.broadcast %59 : vector<8x1xf32> to vector<8x8xf32>
    %61 = arith.mulf %58, %60 : vector<8x8xf32>
    %62 = arith.truncf %61 : vector<8x8xf32> to vector<8x8xbf16>
    %c0_32 = arith.constant 0 : index
    %c0_33 = arith.constant 0 : index
    %63 = vector.load %arg16[%c0_32, %c0_33] : memref<8x128xbf16, #tpu.memory_space<vmem>>, vector<8x8xbf16>
    tpu.vector_store %arg16[%c0_32, %c0_33], %62 {strides = array<i32>} : memref<8x128xbf16, #tpu.memory_space<vmem>>, vector<8x8xbf16>,
    %c0_34 = arith.constant 0 : index
    %c8 = arith.constant 8 : index
    %64 = vector.load %arg15[%c0_34, %c8] : memref<8x384xbf16, #tpu.memory_space<vmem>>, vector<8x8xbf16>
    %c0_35 = arith.constant 0 : index
    %c136 = arith.constant 136 : index
    %65 = vector.load %arg15[%c0_35, %c136] : memref<8x384xbf16, #tpu.memory_space<vmem>>, vector<8x8xbf16>
    %c0_36 = arith.constant 0 : index
    %c264 = arith.constant 264 : index
    %66 = vector.load %arg15[%c0_36, %c264] : memref<8x384xbf16, #tpu.memory_space<vmem>>, vector<8x8xbf16>
    %cst_37 = arith.constant dense<0.000000e+00> : vector<8x8xf32>
    %67 = tpu.matmul %64, %65, %cst_37 {dimension_numbers = #tpu.dot_dimension_numbers<[1], [1], [0], [0], [0, 0, 1, 0], [], []>} : vector<8x8xbf16>, vector<8x8xbf16>, vector<8x8xf32> -> vector<8x8xf32>
    %68 = arith.extf %43 : vector<8x8xbf16> to vector<8x8xf32>
    %69 = arith.addf %67, %68 : vector<8x8xf32>
    %cst_38 = arith.constant dense<0xFF800000> : vector<8xf32>
    %70 = vector.multi_reduction <maximumf>, %69, %cst_38 [1] : vector<8x8xf32> to vector<8xf32>
    %71 = vector.shape_cast %70 : vector<8xf32> to vector<8x1xf32>
    %72 = vector.broadcast %71 : vector<8x1xf32> to vector<8x8xf32>
    %73 = arith.subf %69, %72 : vector<8x8xf32>
    %74 = math.exp %73 : vector<8x8xf32>
    %cst_39 = arith.constant dense<0.000000e+00> : vector<8xf32>
    %75 = vector.multi_reduction <add>, %74, %cst_39 [1] : vector<8x8xf32> to vector<8xf32>
    %76 = vector.shape_cast %75 : vector<8xf32> to vector<8x1xf32>
    %77 = arith.truncf %74 : vector<8x8xf32> to vector<8x8xbf16>
    %cst_40 = arith.constant dense<0.000000e+00> : vector<8x8xf32>
    %78 = tpu.matmul %77, %66, %cst_40 {dimension_numbers = #tpu.dot_dimension_numbers<[1], [0], [0], [1], [0, 0, 1, 1], [], []>} : vector<8x8xbf16>, vector<8x8xbf16>, vector<8x8xf32> -> vector<8x8xf32>
    %79 = tpu.reciprocal %76 {approx = true} : vector<8x1xf32> -> vector<8x1xf32>
    %80 = vector.broadcast %79 : vector<8x1xf32> to vector<8x8xf32>
    %81 = arith.mulf %78, %80 : vector<8x8xf32>
    %82 = arith.truncf %81 : vector<8x8xf32> to vector<8x8xbf16>
    %c0_41 = arith.constant 0 : index
    %c8_42 = arith.constant 8 : index
    %83 = vector.load %arg16[%c0_41, %c8_42] : memref<8x128xbf16, #tpu.memory_space<vmem>>, vector<8x8xbf16>
    tpu.vector_store %arg16[%c0_41, %c8_42], %82 {strides = array<i32>} : memref<8x128xbf16, #tpu.memory_space<vmem>>, vector<8x8xbf16>,
    %c0_43 = arith.constant 0 : index
    %c16 = arith.constant 16 : index
    %84 = vector.load %arg15[%c0_43, %c16] : memref<8x384xbf16, #tpu.memory_space<vmem>>, vector<8x8xbf16>
    %c0_44 = arith.constant 0 : index
    %c144 = arith.constant 144 : index
    %85 = vector.load %arg15[%c0_44, %c144] : memref<8x384xbf16, #tpu.memory_space<vmem>>, vector<8x8xbf16>
    %c0_45 = arith.constant 0 : index
    %c272 = arith.constant 272 : index
    %86 = vector.load %arg15[%c0_45, %c272] : memref<8x384xbf16, #tpu.memory_space<vmem>>, vector<8x8xbf16>
    %cst_46 = arith.constant dense<0.000000e+00> : vector<8x8xf32>
    %87 = tpu.matmul %84, %85, %cst_46 {dimension_numbers = #tpu.dot_dimension_numbers<[1], [1], [0], [0], [0, 0, 1, 0], [], []>} : vector<8x8xbf16>, vector<8x8xbf16>, vector<8x8xf32> -> vector<8x8xf32>
    %88 = arith.extf %43 : vector<8x8xbf16> to vector<8x8xf32>
    %89 = arith.addf %87, %88 : vector<8x8xf32>
    %cst_47 = arith.constant dense<0xFF800000> : vector<8xf32>
    %90 = vector.multi_reduction <maximumf>, %89, %cst_47 [1] : vector<8x8xf32> to vector<8xf32>
    %91 = vector.shape_cast %90 : vector<8xf32> to vector<8x1xf32>
    %92 = vector.broadcast %91 : vector<8x1xf32> to vector<8x8xf32>
    %93 = arith.subf %89, %92 : vector<8x8xf32>
    %94 = math.exp %93 : vector<8x8xf32>
    %cst_48 = arith.constant dense<0.000000e+00> : vector<8xf32>
    %95 = vector.multi_reduction <add>, %94, %cst_48 [1] : vector<8x8xf32> to vector<8xf32>
    %96 = vector.shape_cast %95 : vector<8xf32> to vector<8x1xf32>
    %97 = arith.truncf %94 : vector<8x8xf32> to vector<8x8xbf16>
    %cst_49 = arith.constant dense<0.000000e+00> : vector<8x8xf32>
    %98 = tpu.matmul %97, %86, %cst_49 {dimension_numbers = #tpu.dot_dimension_numbers<[1], [0], [0], [1], [0, 0, 1, 1], [], []>} : vector<8x8xbf16>, vector<8x8xbf16>, vector<8x8xf32> -> vector<8x8xf32>
    %99 = tpu.reciprocal %96 {approx = true} : vector<8x1xf32> -> vector<8x1xf32>
    %100 = vector.broadcast %99 : vector<8x1xf32> to vector<8x8xf32>
    %101 = arith.mulf %98, %100 : vector<8x8xf32>
    %102 = arith.truncf %101 : vector<8x8xf32> to vector<8x8xbf16>
    %c0_50 = arith.constant 0 : index
    %c16_51 = arith.constant 16 : index
    %103 = vector.load %arg16[%c0_50, %c16_51] : memref<8x128xbf16, #tpu.memory_space<vmem>>, vector<8x8xbf16>
    tpu.vector_store %arg16[%c0_50, %c16_51], %102 {strides = array<i32>} : memref<8x128xbf16, #tpu.memory_space<vmem>>, vector<8x8xbf16>,
    %c0_52 = arith.constant 0 : index
    %c24 = arith.constant 24 : index
    %104 = vector.load %arg15[%c0_52, %c24] : memref<8x384xbf16, #tpu.memory_space<vmem>>, vector<8x8xbf16>
    %c0_53 = arith.constant 0 : index
    %c152 = arith.constant 152 : index
    %105 = vector.load %arg15[%c0_53, %c152] : memref<8x384xbf16, #tpu.memory_space<vmem>>, vector<8x8xbf16>
    %c0_54 = arith.constant 0 : index
    %c280 = arith.constant 280 : index
    %106 = vector.load %arg15[%c0_54, %c280] : memref<8x384xbf16, #tpu.memory_space<vmem>>, vector<8x8xbf16>
    %cst_55 = arith.constant dense<0.000000e+00> : vector<8x8xf32>
    %107 = tpu.matmul %104, %105, %cst_55 {dimension_numbers = #tpu.dot_dimension_numbers<[1], [1], [0], [0], [0, 0, 1, 0], [], []>} : vector<8x8xbf16>, vector<8x8xbf16>, vector<8x8xf32> -> vector<8x8xf32>
    %108 = arith.extf %43 : vector<8x8xbf16> to vector<8x8xf32>
    %109 = arith.addf %107, %108 : vector<8x8xf32>
    %cst_56 = arith.constant dense<0xFF800000> : vector<8xf32>
    %110 = vector.multi_reduction <maximumf>, %109, %cst_56 [1] : vector<8x8xf32> to vector<8xf32>
    %111 = vector.shape_cast %110 : vector<8xf32> to vector<8x1xf32>
    %112 = vector.broadcast %111 : vector<8x1xf32> to vector<8x8xf32>
    %113 = arith.subf %109, %112 : vector<8x8xf32>
    %114 = math.exp %113 : vector<8x8xf32>
    %cst_57 = arith.constant dense<0.000000e+00> : vector<8xf32>
    %115 = vector.multi_reduction <add>, %114, %cst_57 [1] : vector<8x8xf32> to vector<8xf32>
    %116 = vector.shape_cast %115 : vector<8xf32> to vector<8x1xf32>
    %117 = arith.truncf %114 : vector<8x8xf32> to vector<8x8xbf16>
    %cst_58 = arith.constant dense<0.000000e+00> : vector<8x8xf32>
    %118 = tpu.matmul %117, %106, %cst_58 {dimension_numbers = #tpu.dot_dimension_numbers<[1], [0], [0], [1], [0, 0, 1, 1], [], []>} : vector<8x8xbf16>, vector<8x8xbf16>, vector<8x8xf32> -> vector<8x8xf32>
    %119 = tpu.reciprocal %116 {approx = true} : vector<8x1xf32> -> vector<8x1xf32>
    %120 = vector.broadcast %119 : vector<8x1xf32> to vector<8x8xf32>
    %121 = arith.mulf %118, %120 : vector<8x8xf32>
    %122 = arith.truncf %121 : vector<8x8xf32> to vector<8x8xbf16>
    %c0_59 = arith.constant 0 : index
    %c24_60 = arith.constant 24 : index
    %123 = vector.load %arg16[%c0_59, %c24_60] : memref<8x128xbf16, #tpu.memory_space<vmem>>, vector<8x8xbf16>
    tpu.vector_store %arg16[%c0_59, %c24_60], %122 {strides = array<i32>} : memref<8x128xbf16, #tpu.memory_space<vmem>>, vector<8x8xbf16>,
    %c0_61 = arith.constant 0 : index
    %c32 = arith.constant 32 : index
    %124 = vector.load %arg15[%c0_61, %c32] : memref<8x384xbf16, #tpu.memory_space<vmem>>, vector<8x8xbf16>
    %c0_62 = arith.constant 0 : index
    %c160 = arith.constant 160 : index
    %125 = vector.load %arg15[%c0_62, %c160] : memref<8x384xbf16, #tpu.memory_space<vmem>>, vector<8x8xbf16>
    %c0_63 = arith.constant 0 : index
    %c288 = arith.constant 288 : index
    %126 = vector.load %arg15[%c0_63, %c288] : memref<8x384xbf16, #tpu.memory_space<vmem>>, vector<8x8xbf16>
    %cst_64 = arith.constant dense<0.000000e+00> : vector<8x8xf32>
    %127 = tpu.matmul %124, %125, %cst_64 {dimension_numbers = #tpu.dot_dimension_numbers<[1], [1], [0], [0], [0, 0, 1, 0], [], []>} : vector<8x8xbf16>, vector<8x8xbf16>, vector<8x8xf32> -> vector<8x8xf32>
    %128 = arith.extf %43 : vector<8x8xbf16> to vector<8x8xf32>
    %129 = arith.addf %127, %128 : vector<8x8xf32>
    %cst_65 = arith.constant dense<0xFF800000> : vector<8xf32>
    %130 = vector.multi_reduction <maximumf>, %129, %cst_65 [1] : vector<8x8xf32> to vector<8xf32>
    %131 = vector.shape_cast %130 : vector<8xf32> to vector<8x1xf32>
    %132 = vector.broadcast %131 : vector<8x1xf32> to vector<8x8xf32>
    %133 = arith.subf %129, %132 : vector<8x8xf32>
    %134 = math.exp %133 : vector<8x8xf32>
    %cst_66 = arith.constant dense<0.000000e+00> : vector<8xf32>
    %135 = vector.multi_reduction <add>, %134, %cst_66 [1] : vector<8x8xf32> to vector<8xf32>
    %136 = vector.shape_cast %135 : vector<8xf32> to vector<8x1xf32>
    %137 = arith.truncf %134 : vector<8x8xf32> to vector<8x8xbf16>
    %cst_67 = arith.constant dense<0.000000e+00> : vector<8x8xf32>
    %138 = tpu.matmul %137, %126, %cst_67 {dimension_numbers = #tpu.dot_dimension_numbers<[1], [0], [0], [1], [0, 0, 1, 1], [], []>} : vector<8x8xbf16>, vector<8x8xbf16>, vector<8x8xf32> -> vector<8x8xf32>
    %139 = tpu.reciprocal %136 {approx = true} : vector<8x1xf32> -> vector<8x1xf32>
    %140 = vector.broadcast %139 : vector<8x1xf32> to vector<8x8xf32>
    %141 = arith.mulf %138, %140 : vector<8x8xf32>
    %142 = arith.truncf %141 : vector<8x8xf32> to vector<8x8xbf16>
    %c0_68 = arith.constant 0 : index
    %c32_69 = arith.constant 32 : index
    %143 = vector.load %arg16[%c0_68, %c32_69] : memref<8x128xbf16, #tpu.memory_space<vmem>>, vector<8x8xbf16>
    tpu.vector_store %arg16[%c0_68, %c32_69], %142 {strides = array<i32>} : memref<8x128xbf16, #tpu.memory_space<vmem>>, vector<8x8xbf16>,
    %c0_70 = arith.constant 0 : index
    %c40 = arith.constant 40 : index
    %144 = vector.load %arg15[%c0_70, %c40] : memref<8x384xbf16, #tpu.memory_space<vmem>>, vector<8x8xbf16>
    %c0_71 = arith.constant 0 : index
    %c168 = arith.constant 168 : index
    %145 = vector.load %arg15[%c0_71, %c168] : memref<8x384xbf16, #tpu.memory_space<vmem>>, vector<8x8xbf16>
    %c0_72 = arith.constant 0 : index
    %c296 = arith.constant 296 : index
    %146 = vector.load %arg15[%c0_72, %c296] : memref<8x384xbf16, #tpu.memory_space<vmem>>, vector<8x8xbf16>
    %cst_73 = arith.constant dense<0.000000e+00> : vector<8x8xf32>
    %147 = tpu.matmul %144, %145, %cst_73 {dimension_numbers = #tpu.dot_dimension_numbers<[1], [1], [0], [0], [0, 0, 1, 0], [], []>} : vector<8x8xbf16>, vector<8x8xbf16>, vector<8x8xf32> -> vector<8x8xf32>
    %148 = arith.extf %43 : vector<8x8xbf16> to vector<8x8xf32>
    %149 = arith.addf %147, %148 : vector<8x8xf32>
    %cst_74 = arith.constant dense<0xFF800000> : vector<8xf32>
    %150 = vector.multi_reduction <maximumf>, %149, %cst_74 [1] : vector<8x8xf32> to vector<8xf32>
    %151 = vector.shape_cast %150 : vector<8xf32> to vector<8x1xf32>
    %152 = vector.broadcast %151 : vector<8x1xf32> to vector<8x8xf32>
    %153 = arith.subf %149, %152 : vector<8x8xf32>
    %154 = math.exp %153 : vector<8x8xf32>
    %cst_75 = arith.constant dense<0.000000e+00> : vector<8xf32>
    %155 = vector.multi_reduction <add>, %154, %cst_75 [1] : vector<8x8xf32> to vector<8xf32>
    %156 = vector.shape_cast %155 : vector<8xf32> to vector<8x1xf32>
    %157 = arith.truncf %154 : vector<8x8xf32> to vector<8x8xbf16>
    %cst_76 = arith.constant dense<0.000000e+00> : vector<8x8xf32>
    %158 = tpu.matmul %157, %146, %cst_76 {dimension_numbers = #tpu.dot_dimension_numbers<[1], [0], [0], [1], [0, 0, 1, 1], [], []>} : vector<8x8xbf16>, vector<8x8xbf16>, vector<8x8xf32> -> vector<8x8xf32>
    %159 = tpu.reciprocal %156 {approx = true} : vector<8x1xf32> -> vector<8x1xf32>
    %160 = vector.broadcast %159 : vector<8x1xf32> to vector<8x8xf32>
    %161 = arith.mulf %158, %160 : vector<8x8xf32>
    %162 = arith.truncf %161 : vector<8x8xf32> to vector<8x8xbf16>
    %c0_77 = arith.constant 0 : index
    %c40_78 = arith.constant 40 : index
    %163 = vector.load %arg16[%c0_77, %c40_78] : memref<8x128xbf16, #tpu.memory_space<vmem>>, vector<8x8xbf16>
    tpu.vector_store %arg16[%c0_77, %c40_78], %162 {strides = array<i32>} : memref<8x128xbf16, #tpu.memory_space<vmem>>, vector<8x8xbf16>,
    %c0_79 = arith.constant 0 : index
    %c48 = arith.constant 48 : index
    %164 = vector.load %arg15[%c0_79, %c48] : memref<8x384xbf16, #tpu.memory_space<vmem>>, vector<8x8xbf16>
    %c0_80 = arith.constant 0 : index
    %c176 = arith.constant 176 : index
    %165 = vector.load %arg15[%c0_80, %c176] : memref<8x384xbf16, #tpu.memory_space<vmem>>, vector<8x8xbf16>
    %c0_81 = arith.constant 0 : index
    %c304 = arith.constant 304 : index
    %166 = vector.load %arg15[%c0_81, %c304] : memref<8x384xbf16, #tpu.memory_space<vmem>>, vector<8x8xbf16>
    %cst_82 = arith.constant dense<0.000000e+00> : vector<8x8xf32>
    %167 = tpu.matmul %164, %165, %cst_82 {dimension_numbers = #tpu.dot_dimension_numbers<[1], [1], [0], [0], [0, 0, 1, 0], [], []>} : vector<8x8xbf16>, vector<8x8xbf16>, vector<8x8xf32> -> vector<8x8xf32>
    %168 = arith.extf %43 : vector<8x8xbf16> to vector<8x8xf32>
    %169 = arith.addf %167, %168 : vector<8x8xf32>
    %cst_83 = arith.constant dense<0xFF800000> : vector<8xf32>
    %170 = vector.multi_reduction <maximumf>, %169, %cst_83 [1] : vector<8x8xf32> to vector<8xf32>
    %171 = vector.shape_cast %170 : vector<8xf32> to vector<8x1xf32>
    %172 = vector.broadcast %171 : vector<8x1xf32> to vector<8x8xf32>
    %173 = arith.subf %169, %172 : vector<8x8xf32>
    %174 = math.exp %173 : vector<8x8xf32>
    %cst_84 = arith.constant dense<0.000000e+00> : vector<8xf32>
    %175 = vector.multi_reduction <add>, %174, %cst_84 [1] : vector<8x8xf32> to vector<8xf32>
    %176 = vector.shape_cast %175 : vector<8xf32> to vector<8x1xf32>
    %177 = arith.truncf %174 : vector<8x8xf32> to vector<8x8xbf16>
    %cst_85 = arith.constant dense<0.000000e+00> : vector<8x8xf32>
    %178 = tpu.matmul %177, %166, %cst_85 {dimension_numbers = #tpu.dot_dimension_numbers<[1], [0], [0], [1], [0, 0, 1, 1], [], []>} : vector<8x8xbf16>, vector<8x8xbf16>, vector<8x8xf32> -> vector<8x8xf32>
    %179 = tpu.reciprocal %176 {approx = true} : vector<8x1xf32> -> vector<8x1xf32>
    %180 = vector.broadcast %179 : vector<8x1xf32> to vector<8x8xf32>
    %181 = arith.mulf %178, %180 : vector<8x8xf32>
    %182 = arith.truncf %181 : vector<8x8xf32> to vector<8x8xbf16>
    %c0_86 = arith.constant 0 : index
    %c48_87 = arith.constant 48 : index
    %183 = vector.load %arg16[%c0_86, %c48_87] : memref<8x128xbf16, #tpu.memory_space<vmem>>, vector<8x8xbf16>
    tpu.vector_store %arg16[%c0_86, %c48_87], %182 {strides = array<i32>} : memref<8x128xbf16, #tpu.memory_space<vmem>>, vector<8x8xbf16>,
    %c0_88 = arith.constant 0 : index
    %c56 = arith.constant 56 : index
    %184 = vector.load %arg15[%c0_88, %c56] : memref<8x384xbf16, #tpu.memory_space<vmem>>, vector<8x8xbf16>
    %c0_89 = arith.constant 0 : index
    %c184 = arith.constant 184 : index
    %185 = vector.load %arg15[%c0_89, %c184] : memref<8x384xbf16, #tpu.memory_space<vmem>>, vector<8x8xbf16>
    %c0_90 = arith.constant 0 : index
    %c312 = arith.constant 312 : index
    %186 = vector.load %arg15[%c0_90, %c312] : memref<8x384xbf16, #tpu.memory_space<vmem>>, vector<8x8xbf16>
    %cst_91 = arith.constant dense<0.000000e+00> : vector<8x8xf32>
    %187 = tpu.matmul %184, %185, %cst_91 {dimension_numbers = #tpu.dot_dimension_numbers<[1], [1], [0], [0], [0, 0, 1, 0], [], []>} : vector<8x8xbf16>, vector<8x8xbf16>, vector<8x8xf32> -> vector<8x8xf32>
    %188 = arith.extf %43 : vector<8x8xbf16> to vector<8x8xf32>
    %189 = arith.addf %187, %188 : vector<8x8xf32>
    %cst_92 = arith.constant dense<0xFF800000> : vector<8xf32>
    %190 = vector.multi_reduction <maximumf>, %189, %cst_92 [1] : vector<8x8xf32> to vector<8xf32>
    %191 = vector.shape_cast %190 : vector<8xf32> to vector<8x1xf32>
    %192 = vector.broadcast %191 : vector<8x1xf32> to vector<8x8xf32>
    %193 = arith.subf %189, %192 : vector<8x8xf32>
    %194 = math.exp %193 : vector<8x8xf32>
    %cst_93 = arith.constant dense<0.000000e+00> : vector<8xf32>
    %195 = vector.multi_reduction <add>, %194, %cst_93 [1] : vector<8x8xf32> to vector<8xf32>
    %196 = vector.shape_cast %195 : vector<8xf32> to vector<8x1xf32>
    %197 = arith.truncf %194 : vector<8x8xf32> to vector<8x8xbf16>
    %cst_94 = arith.constant dense<0.000000e+00> : vector<8x8xf32>
    %198 = tpu.matmul %197, %186, %cst_94 {dimension_numbers = #tpu.dot_dimension_numbers<[1], [0], [0], [1], [0, 0, 1, 1], [], []>} : vector<8x8xbf16>, vector<8x8xbf16>, vector<8x8xf32> -> vector<8x8xf32>
    %199 = tpu.reciprocal %196 {approx = true} : vector<8x1xf32> -> vector<8x1xf32>
    %200 = vector.broadcast %199 : vector<8x1xf32> to vector<8x8xf32>
    %201 = arith.mulf %198, %200 : vector<8x8xf32>
    %202 = arith.truncf %201 : vector<8x8xf32> to vector<8x8xbf16>
    %c0_95 = arith.constant 0 : index
    %c56_96 = arith.constant 56 : index
    %203 = vector.load %arg16[%c0_95, %c56_96] : memref<8x128xbf16, #tpu.memory_space<vmem>>, vector<8x8xbf16>
    tpu.vector_store %arg16[%c0_95, %c56_96], %202 {strides = array<i32>} : memref<8x128xbf16, #tpu.memory_space<vmem>>, vector<8x8xbf16>,
    %c0_97 = arith.constant 0 : index
    %c64 = arith.constant 64 : index
    %204 = vector.load %arg15[%c0_97, %c64] : memref<8x384xbf16, #tpu.memory_space<vmem>>, vector<8x8xbf16>
    %c0_98 = arith.constant 0 : index
    %c192 = arith.constant 192 : index
    %205 = vector.load %arg15[%c0_98, %c192] : memref<8x384xbf16, #tpu.memory_space<vmem>>, vector<8x8xbf16>
    %c0_99 = arith.constant 0 : index
    %c320 = arith.constant 320 : index
    %206 = vector.load %arg15[%c0_99, %c320] : memref<8x384xbf16, #tpu.memory_space<vmem>>, vector<8x8xbf16>
    %cst_100 = arith.constant dense<0.000000e+00> : vector<8x8xf32>
    %207 = tpu.matmul %204, %205, %cst_100 {dimension_numbers = #tpu.dot_dimension_numbers<[1], [1], [0], [0], [0, 0, 1, 0], [], []>} : vector<8x8xbf16>, vector<8x8xbf16>, vector<8x8xf32> -> vector<8x8xf32>
    %208 = arith.extf %43 : vector<8x8xbf16> to vector<8x8xf32>
    %209 = arith.addf %207, %208 : vector<8x8xf32>
    %cst_101 = arith.constant dense<0xFF800000> : vector<8xf32>
    %210 = vector.multi_reduction <maximumf>, %209, %cst_101 [1] : vector<8x8xf32> to vector<8xf32>
    %211 = vector.shape_cast %210 : vector<8xf32> to vector<8x1xf32>
    %212 = vector.broadcast %211 : vector<8x1xf32> to vector<8x8xf32>
    %213 = arith.subf %209, %212 : vector<8x8xf32>
    %214 = math.exp %213 : vector<8x8xf32>
    %cst_102 = arith.constant dense<0.000000e+00> : vector<8xf32>
    %215 = vector.multi_reduction <add>, %214, %cst_102 [1] : vector<8x8xf32> to vector<8xf32>
    %216 = vector.shape_cast %215 : vector<8xf32> to vector<8x1xf32>
    %217 = arith.truncf %214 : vector<8x8xf32> to vector<8x8xbf16>
    %cst_103 = arith.constant dense<0.000000e+00> : vector<8x8xf32>
    %218 = tpu.matmul %217, %206, %cst_103 {dimension_numbers = #tpu.dot_dimension_numbers<[1], [0], [0], [1], [0, 0, 1, 1], [], []>} : vector<8x8xbf16>, vector<8x8xbf16>, vector<8x8xf32> -> vector<8x8xf32>
    %219 = tpu.reciprocal %216 {approx = true} : vector<8x1xf32> -> vector<8x1xf32>
    %220 = vector.broadcast %219 : vector<8x1xf32> to vector<8x8xf32>
    %221 = arith.mulf %218, %220 : vector<8x8xf32>
    %222 = arith.truncf %221 : vector<8x8xf32> to vector<8x8xbf16>
    %c0_104 = arith.constant 0 : index
    %c64_105 = arith.constant 64 : index
    %223 = vector.load %arg16[%c0_104, %c64_105] : memref<8x128xbf16, #tpu.memory_space<vmem>>, vector<8x8xbf16>
    tpu.vector_store %arg16[%c0_104, %c64_105], %222 {strides = array<i32>} : memref<8x128xbf16, #tpu.memory_space<vmem>>, vector<8x8xbf16>,
    %c0_106 = arith.constant 0 : index
    %c72 = arith.constant 72 : index
    %224 = vector.load %arg15[%c0_106, %c72] : memref<8x384xbf16, #tpu.memory_space<vmem>>, vector<8x8xbf16>
    %c0_107 = arith.constant 0 : index
    %c200 = arith.constant 200 : index
    %225 = vector.load %arg15[%c0_107, %c200] : memref<8x384xbf16, #tpu.memory_space<vmem>>, vector<8x8xbf16>
    %c0_108 = arith.constant 0 : index
    %c328 = arith.constant 328 : index
    %226 = vector.load %arg15[%c0_108, %c328] : memref<8x384xbf16, #tpu.memory_space<vmem>>, vector<8x8xbf16>
    %cst_109 = arith.constant dense<0.000000e+00> : vector<8x8xf32>
    %227 = tpu.matmul %224, %225, %cst_109 {dimension_numbers = #tpu.dot_dimension_numbers<[1], [1], [0], [0], [0, 0, 1, 0], [], []>} : vector<8x8xbf16>, vector<8x8xbf16>, vector<8x8xf32> -> vector<8x8xf32>
    %228 = arith.extf %43 : vector<8x8xbf16> to vector<8x8xf32>
    %229 = arith.addf %227, %228 : vector<8x8xf32>
    %cst_110 = arith.constant dense<0xFF800000> : vector<8xf32>
    %230 = vector.multi_reduction <maximumf>, %229, %cst_110 [1] : vector<8x8xf32> to vector<8xf32>
    %231 = vector.shape_cast %230 : vector<8xf32> to vector<8x1xf32>
    %232 = vector.broadcast %231 : vector<8x1xf32> to vector<8x8xf32>
    %233 = arith.subf %229, %232 : vector<8x8xf32>
    %234 = math.exp %233 : vector<8x8xf32>
    %cst_111 = arith.constant dense<0.000000e+00> : vector<8xf32>
    %235 = vector.multi_reduction <add>, %234, %cst_111 [1] : vector<8x8xf32> to vector<8xf32>
    %236 = vector.shape_cast %235 : vector<8xf32> to vector<8x1xf32>
    %237 = arith.truncf %234 : vector<8x8xf32> to vector<8x8xbf16>
    %cst_112 = arith.constant dense<0.000000e+00> : vector<8x8xf32>
    %238 = tpu.matmul %237, %226, %cst_112 {dimension_numbers = #tpu.dot_dimension_numbers<[1], [0], [0], [1], [0, 0, 1, 1], [], []>} : vector<8x8xbf16>, vector<8x8xbf16>, vector<8x8xf32> -> vector<8x8xf32>
    %239 = tpu.reciprocal %236 {approx = true} : vector<8x1xf32> -> vector<8x1xf32>
    %240 = vector.broadcast %239 : vector<8x1xf32> to vector<8x8xf32>
    %241 = arith.mulf %238, %240 : vector<8x8xf32>
    %242 = arith.truncf %241 : vector<8x8xf32> to vector<8x8xbf16>
    %c0_113 = arith.constant 0 : index
    %c72_114 = arith.constant 72 : index
    %243 = vector.load %arg16[%c0_113, %c72_114] : memref<8x128xbf16, #tpu.memory_space<vmem>>, vector<8x8xbf16>
    tpu.vector_store %arg16[%c0_113, %c72_114], %242 {strides = array<i32>} : memref<8x128xbf16, #tpu.memory_space<vmem>>, vector<8x8xbf16>,
    %c0_115 = arith.constant 0 : index
    %c80 = arith.constant 80 : index
    %244 = vector.load %arg15[%c0_115, %c80] : memref<8x384xbf16, #tpu.memory_space<vmem>>, vector<8x8xbf16>
    %c0_116 = arith.constant 0 : index
    %c208 = arith.constant 208 : index
    %245 = vector.load %arg15[%c0_116, %c208] : memref<8x384xbf16, #tpu.memory_space<vmem>>, vector<8x8xbf16>
    %c0_117 = arith.constant 0 : index
    %c336 = arith.constant 336 : index
    %246 = vector.load %arg15[%c0_117, %c336] : memref<8x384xbf16, #tpu.memory_space<vmem>>, vector<8x8xbf16>
    %cst_118 = arith.constant dense<0.000000e+00> : vector<8x8xf32>
    %247 = tpu.matmul %244, %245, %cst_118 {dimension_numbers = #tpu.dot_dimension_numbers<[1], [1], [0], [0], [0, 0, 1, 0], [], []>} : vector<8x8xbf16>, vector<8x8xbf16>, vector<8x8xf32> -> vector<8x8xf32>
    %248 = arith.extf %43 : vector<8x8xbf16> to vector<8x8xf32>
    %249 = arith.addf %247, %248 : vector<8x8xf32>
    %cst_119 = arith.constant dense<0xFF800000> : vector<8xf32>
    %250 = vector.multi_reduction <maximumf>, %249, %cst_119 [1] : vector<8x8xf32> to vector<8xf32>
    %251 = vector.shape_cast %250 : vector<8xf32> to vector<8x1xf32>
    %252 = vector.broadcast %251 : vector<8x1xf32> to vector<8x8xf32>
    %253 = arith.subf %249, %252 : vector<8x8xf32>
    %254 = math.exp %253 : vector<8x8xf32>
    %cst_120 = arith.constant dense<0.000000e+00> : vector<8xf32>
    %255 = vector.multi_reduction <add>, %254, %cst_120 [1] : vector<8x8xf32> to vector<8xf32>
    %256 = vector.shape_cast %255 : vector<8xf32> to vector<8x1xf32>
    %257 = arith.truncf %254 : vector<8x8xf32> to vector<8x8xbf16>
    %cst_121 = arith.constant dense<0.000000e+00> : vector<8x8xf32>
    %258 = tpu.matmul %257, %246, %cst_121 {dimension_numbers = #tpu.dot_dimension_numbers<[1], [0], [0], [1], [0, 0, 1, 1], [], []>} : vector<8x8xbf16>, vector<8x8xbf16>, vector<8x8xf32> -> vector<8x8xf32>
    %259 = tpu.reciprocal %256 {approx = true} : vector<8x1xf32> -> vector<8x1xf32>
    %260 = vector.broadcast %259 : vector<8x1xf32> to vector<8x8xf32>
    %261 = arith.mulf %258, %260 : vector<8x8xf32>
    %262 = arith.truncf %261 : vector<8x8xf32> to vector<8x8xbf16>
    %c0_122 = arith.constant 0 : index
    %c80_123 = arith.constant 80 : index
    %263 = vector.load %arg16[%c0_122, %c80_123] : memref<8x128xbf16, #tpu.memory_space<vmem>>, vector<8x8xbf16>
    tpu.vector_store %arg16[%c0_122, %c80_123], %262 {strides = array<i32>} : memref<8x128xbf16, #tpu.memory_space<vmem>>, vector<8x8xbf16>,
    %c0_124 = arith.constant 0 : index
    %c88 = arith.constant 88 : index
    %264 = vector.load %arg15[%c0_124, %c88] : memref<8x384xbf16, #tpu.memory_space<vmem>>, vector<8x8xbf16>
    %c0_125 = arith.constant 0 : index
    %c216 = arith.constant 216 : index
    %265 = vector.load %arg15[%c0_125, %c216] : memref<8x384xbf16, #tpu.memory_space<vmem>>, vector<8x8xbf16>
    %c0_126 = arith.constant 0 : index
    %c344 = arith.constant 344 : index
    %266 = vector.load %arg15[%c0_126, %c344] : memref<8x384xbf16, #tpu.memory_space<vmem>>, vector<8x8xbf16>
    %cst_127 = arith.constant dense<0.000000e+00> : vector<8x8xf32>
    %267 = tpu.matmul %264, %265, %cst_127 {dimension_numbers = #tpu.dot_dimension_numbers<[1], [1], [0], [0], [0, 0, 1, 0], [], []>} : vector<8x8xbf16>, vector<8x8xbf16>, vector<8x8xf32> -> vector<8x8xf32>
    %268 = arith.extf %43 : vector<8x8xbf16> to vector<8x8xf32>
    %269 = arith.addf %267, %268 : vector<8x8xf32>
    %cst_128 = arith.constant dense<0xFF800000> : vector<8xf32>
    %270 = vector.multi_reduction <maximumf>, %269, %cst_128 [1] : vector<8x8xf32> to vector<8xf32>
    %271 = vector.shape_cast %270 : vector<8xf32> to vector<8x1xf32>
    %272 = vector.broadcast %271 : vector<8x1xf32> to vector<8x8xf32>
    %273 = arith.subf %269, %272 : vector<8x8xf32>
    %274 = math.exp %273 : vector<8x8xf32>
    %cst_129 = arith.constant dense<0.000000e+00> : vector<8xf32>
    %275 = vector.multi_reduction <add>, %274, %cst_129 [1] : vector<8x8xf32> to vector<8xf32>
    %276 = vector.shape_cast %275 : vector<8xf32> to vector<8x1xf32>
    %277 = arith.truncf %274 : vector<8x8xf32> to vector<8x8xbf16>
    %cst_130 = arith.constant dense<0.000000e+00> : vector<8x8xf32>
    %278 = tpu.matmul %277, %266, %cst_130 {dimension_numbers = #tpu.dot_dimension_numbers<[1], [0], [0], [1], [0, 0, 1, 1], [], []>} : vector<8x8xbf16>, vector<8x8xbf16>, vector<8x8xf32> -> vector<8x8xf32>
    %279 = tpu.reciprocal %276 {approx = true} : vector<8x1xf32> -> vector<8x1xf32>
    %280 = vector.broadcast %279 : vector<8x1xf32> to vector<8x8xf32>
    %281 = arith.mulf %278, %280 : vector<8x8xf32>
    %282 = arith.truncf %281 : vector<8x8xf32> to vector<8x8xbf16>
    %c0_131 = arith.constant 0 : index
    %c88_132 = arith.constant 88 : index
    %283 = vector.load %arg16[%c0_131, %c88_132] : memref<8x128xbf16, #tpu.memory_space<vmem>>, vector<8x8xbf16>
    tpu.vector_store %arg16[%c0_131, %c88_132], %282 {strides = array<i32>} : memref<8x128xbf16, #tpu.memory_space<vmem>>, vector<8x8xbf16>,
    %c0_133 = arith.constant 0 : index
    %c96 = arith.constant 96 : index
    %284 = vector.load %arg15[%c0_133, %c96] : memref<8x384xbf16, #tpu.memory_space<vmem>>, vector<8x8xbf16>
    %c0_134 = arith.constant 0 : index
    %c224 = arith.constant 224 : index
    %285 = vector.load %arg15[%c0_134, %c224] : memref<8x384xbf16, #tpu.memory_space<vmem>>, vector<8x8xbf16>
    %c0_135 = arith.constant 0 : index
    %c352 = arith.constant 352 : index
    %286 = vector.load %arg15[%c0_135, %c352] : memref<8x384xbf16, #tpu.memory_space<vmem>>, vector<8x8xbf16>
    %cst_136 = arith.constant dense<0.000000e+00> : vector<8x8xf32>
    %287 = tpu.matmul %284, %285, %cst_136 {dimension_numbers = #tpu.dot_dimension_numbers<[1], [1], [0], [0], [0, 0, 1, 0], [], []>} : vector<8x8xbf16>, vector<8x8xbf16>, vector<8x8xf32> -> vector<8x8xf32>
    %288 = arith.extf %43 : vector<8x8xbf16> to vector<8x8xf32>
    %289 = arith.addf %287, %288 : vector<8x8xf32>
    %cst_137 = arith.constant dense<0xFF800000> : vector<8xf32>
    %290 = vector.multi_reduction <maximumf>, %289, %cst_137 [1] : vector<8x8xf32> to vector<8xf32>
    %291 = vector.shape_cast %290 : vector<8xf32> to vector<8x1xf32>
    %292 = vector.broadcast %291 : vector<8x1xf32> to vector<8x8xf32>
    %293 = arith.subf %289, %292 : vector<8x8xf32>
    %294 = math.exp %293 : vector<8x8xf32>
    %cst_138 = arith.constant dense<0.000000e+00> : vector<8xf32>
    %295 = vector.multi_reduction <add>, %294, %cst_138 [1] : vector<8x8xf32> to vector<8xf32>
    %296 = vector.shape_cast %295 : vector<8xf32> to vector<8x1xf32>
    %297 = arith.truncf %294 : vector<8x8xf32> to vector<8x8xbf16>
    %cst_139 = arith.constant dense<0.000000e+00> : vector<8x8xf32>
    %298 = tpu.matmul %297, %286, %cst_139 {dimension_numbers = #tpu.dot_dimension_numbers<[1], [0], [0], [1], [0, 0, 1, 1], [], []>} : vector<8x8xbf16>, vector<8x8xbf16>, vector<8x8xf32> -> vector<8x8xf32>
    %299 = tpu.reciprocal %296 {approx = true} : vector<8x1xf32> -> vector<8x1xf32>
    %300 = vector.broadcast %299 : vector<8x1xf32> to vector<8x8xf32>
    %301 = arith.mulf %298, %300 : vector<8x8xf32>
    %302 = arith.truncf %301 : vector<8x8xf32> to vector<8x8xbf16>
    %c0_140 = arith.constant 0 : index
    %c96_141 = arith.constant 96 : index
    %303 = vector.load %arg16[%c0_140, %c96_141] : memref<8x128xbf16, #tpu.memory_space<vmem>>, vector<8x8xbf16>
    tpu.vector_store %arg16[%c0_140, %c96_141], %302 {strides = array<i32>} : memref<8x128xbf16, #tpu.memory_space<vmem>>, vector<8x8xbf16>,
    %c0_142 = arith.constant 0 : index
    %c104 = arith.constant 104 : index
    %304 = vector.load %arg15[%c0_142, %c104] : memref<8x384xbf16, #tpu.memory_space<vmem>>, vector<8x8xbf16>
    %c0_143 = arith.constant 0 : index
    %c232 = arith.constant 232 : index
    %305 = vector.load %arg15[%c0_143, %c232] : memref<8x384xbf16, #tpu.memory_space<vmem>>, vector<8x8xbf16>
    %c0_144 = arith.constant 0 : index
    %c360 = arith.constant 360 : index
    %306 = vector.load %arg15[%c0_144, %c360] : memref<8x384xbf16, #tpu.memory_space<vmem>>, vector<8x8xbf16>
    %cst_145 = arith.constant dense<0.000000e+00> : vector<8x8xf32>
    %307 = tpu.matmul %304, %305, %cst_145 {dimension_numbers = #tpu.dot_dimension_numbers<[1], [1], [0], [0], [0, 0, 1, 0], [], []>} : vector<8x8xbf16>, vector<8x8xbf16>, vector<8x8xf32> -> vector<8x8xf32>
    %308 = arith.extf %43 : vector<8x8xbf16> to vector<8x8xf32>
    %309 = arith.addf %307, %308 : vector<8x8xf32>
    %cst_146 = arith.constant dense<0xFF800000> : vector<8xf32>
    %310 = vector.multi_reduction <maximumf>, %309, %cst_146 [1] : vector<8x8xf32> to vector<8xf32>
    %311 = vector.shape_cast %310 : vector<8xf32> to vector<8x1xf32>
    %312 = vector.broadcast %311 : vector<8x1xf32> to vector<8x8xf32>
    %313 = arith.subf %309, %312 : vector<8x8xf32>
    %314 = math.exp %313 : vector<8x8xf32>
    %cst_147 = arith.constant dense<0.000000e+00> : vector<8xf32>
    %315 = vector.multi_reduction <add>, %314, %cst_147 [1] : vector<8x8xf32> to vector<8xf32>
    %316 = vector.shape_cast %315 : vector<8xf32> to vector<8x1xf32>
    %317 = arith.truncf %314 : vector<8x8xf32> to vector<8x8xbf16>
    %cst_148 = arith.constant dense<0.000000e+00> : vector<8x8xf32>
    %318 = tpu.matmul %317, %306, %cst_148 {dimension_numbers = #tpu.dot_dimension_numbers<[1], [0], [0], [1], [0, 0, 1, 1], [], []>} : vector<8x8xbf16>, vector<8x8xbf16>, vector<8x8xf32> -> vector<8x8xf32>
    %319 = tpu.reciprocal %316 {approx = true} : vector<8x1xf32> -> vector<8x1xf32>
    %320 = vector.broadcast %319 : vector<8x1xf32> to vector<8x8xf32>
    %321 = arith.mulf %318, %320 : vector<8x8xf32>
    %322 = arith.truncf %321 : vector<8x8xf32> to vector<8x8xbf16>
    %c0_149 = arith.constant 0 : index
    %c104_150 = arith.constant 104 : index
    %323 = vector.load %arg16[%c0_149, %c104_150] : memref<8x128xbf16, #tpu.memory_space<vmem>>, vector<8x8xbf16>
    tpu.vector_store %arg16[%c0_149, %c104_150], %322 {strides = array<i32>} : memref<8x128xbf16, #tpu.memory_space<vmem>>, vector<8x8xbf16>,
    %c0_151 = arith.constant 0 : index
    %c112 = arith.constant 112 : index
    %324 = vector.load %arg15[%c0_151, %c112] : memref<8x384xbf16, #tpu.memory_space<vmem>>, vector<8x8xbf16>
    %c0_152 = arith.constant 0 : index
    %c240 = arith.constant 240 : index
    %325 = vector.load %arg15[%c0_152, %c240] : memref<8x384xbf16, #tpu.memory_space<vmem>>, vector<8x8xbf16>
    %c0_153 = arith.constant 0 : index
    %c368 = arith.constant 368 : index
    %326 = vector.load %arg15[%c0_153, %c368] : memref<8x384xbf16, #tpu.memory_space<vmem>>, vector<8x8xbf16>
    %cst_154 = arith.constant dense<0.000000e+00> : vector<8x8xf32>
    %327 = tpu.matmul %324, %325, %cst_154 {dimension_numbers = #tpu.dot_dimension_numbers<[1], [1], [0], [0], [0, 0, 1, 0], [], []>} : vector<8x8xbf16>, vector<8x8xbf16>, vector<8x8xf32> -> vector<8x8xf32>
    %328 = arith.extf %43 : vector<8x8xbf16> to vector<8x8xf32>
    %329 = arith.addf %327, %328 : vector<8x8xf32>
    %cst_155 = arith.constant dense<0xFF800000> : vector<8xf32>
    %330 = vector.multi_reduction <maximumf>, %329, %cst_155 [1] : vector<8x8xf32> to vector<8xf32>
    %331 = vector.shape_cast %330 : vector<8xf32> to vector<8x1xf32>
    %332 = vector.broadcast %331 : vector<8x1xf32> to vector<8x8xf32>
    %333 = arith.subf %329, %332 : vector<8x8xf32>
    %334 = math.exp %333 : vector<8x8xf32>
    %cst_156 = arith.constant dense<0.000000e+00> : vector<8xf32>
    %335 = vector.multi_reduction <add>, %334, %cst_156 [1] : vector<8x8xf32> to vector<8xf32>
    %336 = vector.shape_cast %335 : vector<8xf32> to vector<8x1xf32>
    %337 = arith.truncf %334 : vector<8x8xf32> to vector<8x8xbf16>
    %cst_157 = arith.constant dense<0.000000e+00> : vector<8x8xf32>
    %338 = tpu.matmul %337, %326, %cst_157 {dimension_numbers = #tpu.dot_dimension_numbers<[1], [0], [0], [1], [0, 0, 1, 1], [], []>} : vector<8x8xbf16>, vector<8x8xbf16>, vector<8x8xf32> -> vector<8x8xf32>
    %339 = tpu.reciprocal %336 {approx = true} : vector<8x1xf32> -> vector<8x1xf32>
    %340 = vector.broadcast %339 : vector<8x1xf32> to vector<8x8xf32>
    %341 = arith.mulf %338, %340 : vector<8x8xf32>
    %342 = arith.truncf %341 : vector<8x8xf32> to vector<8x8xbf16>
    %c0_158 = arith.constant 0 : index
    %c112_159 = arith.constant 112 : index
    %343 = vector.load %arg16[%c0_158, %c112_159] : memref<8x128xbf16, #tpu.memory_space<vmem>>, vector<8x8xbf16>
    tpu.vector_store %arg16[%c0_158, %c112_159], %342 {strides = array<i32>} : memref<8x128xbf16, #tpu.memory_space<vmem>>, vector<8x8xbf16>,
    %c0_160 = arith.constant 0 : index
    %c120 = arith.constant 120 : index
    %344 = vector.load %arg15[%c0_160, %c120] : memref<8x384xbf16, #tpu.memory_space<vmem>>, vector<8x8xbf16>
    %c0_161 = arith.constant 0 : index
    %c248 = arith.constant 248 : index
    %345 = vector.load %arg15[%c0_161, %c248] : memref<8x384xbf16, #tpu.memory_space<vmem>>, vector<8x8xbf16>
    %c0_162 = arith.constant 0 : index
    %c376 = arith.constant 376 : index
    %346 = vector.load %arg15[%c0_162, %c376] : memref<8x384xbf16, #tpu.memory_space<vmem>>, vector<8x8xbf16>
    %cst_163 = arith.constant dense<0.000000e+00> : vector<8x8xf32>
    %347 = tpu.matmul %344, %345, %cst_163 {dimension_numbers = #tpu.dot_dimension_numbers<[1], [1], [0], [0], [0, 0, 1, 0], [], []>} : vector<8x8xbf16>, vector<8x8xbf16>, vector<8x8xf32> -> vector<8x8xf32>
    %348 = arith.extf %43 : vector<8x8xbf16> to vector<8x8xf32>
    %349 = arith.addf %347, %348 : vector<8x8xf32>
    %cst_164 = arith.constant dense<0xFF800000> : vector<8xf32>
    %350 = vector.multi_reduction <maximumf>, %349, %cst_164 [1] : vector<8x8xf32> to vector<8xf32>
    %351 = vector.shape_cast %350 : vector<8xf32> to vector<8x1xf32>
    %352 = vector.broadcast %351 : vector<8x1xf32> to vector<8x8xf32>
    %353 = arith.subf %349, %352 : vector<8x8xf32>
    %354 = math.exp %353 : vector<8x8xf32>
    %cst_165 = arith.constant dense<0.000000e+00> : vector<8xf32>
    %355 = vector.multi_reduction <add>, %354, %cst_165 [1] : vector<8x8xf32> to vector<8xf32>
    %356 = vector.shape_cast %355 : vector<8xf32> to vector<8x1xf32>
    %357 = arith.truncf %354 : vector<8x8xf32> to vector<8x8xbf16>
    %cst_166 = arith.constant dense<0.000000e+00> : vector<8x8xf32>
    %358 = tpu.matmul %357, %346, %cst_166 {dimension_numbers = #tpu.dot_dimension_numbers<[1], [0], [0], [1], [0, 0, 1, 1], [], []>} : vector<8x8xbf16>, vector<8x8xbf16>, vector<8x8xf32> -> vector<8x8xf32>
    %359 = tpu.reciprocal %356 {approx = true} : vector<8x1xf32> -> vector<8x1xf32>
    %360 = vector.broadcast %359 : vector<8x1xf32> to vector<8x8xf32>
    %361 = arith.mulf %358, %360 : vector<8x8xf32>
    %362 = arith.truncf %361 : vector<8x8xf32> to vector<8x8xbf16>
    %c0_167 = arith.constant 0 : index
    %c120_168 = arith.constant 120 : index
    %363 = vector.load %arg16[%c0_167, %c120_168] : memref<8x128xbf16, #tpu.memory_space<vmem>>, vector<8x8xbf16>
    tpu.vector_store %arg16[%c0_167, %c120_168], %362 {strides = array<i32>} : memref<8x128xbf16, #tpu.memory_space<vmem>>, vector<8x8xbf16>,
    %c0_169 = arith.constant 0 : index
    %c0_170 = arith.constant 0 : index
    %364 = vector.load %arg16[%c0_169, %c0_170] : memref<8x128xbf16, #tpu.memory_space<vmem>>, vector<8x128xbf16>
    %c0_171 = arith.constant 0 : index
    %c0_172 = arith.constant 0 : index
    %365 = vector.load %arg8[%c0_171, %c0_172] : memref<128x32xbf16, #tpu.memory_space<vmem>>, vector<128x32xbf16>
    %cst_173 = arith.constant dense<0.000000e+00> : vector<8x32xf32>
    %366 = tpu.matmul %364, %365, %cst_173 {dimension_numbers = #tpu.dot_dimension_numbers<[1], [0], [0], [1], [0, 0, 1, 1], [], []>} : vector<8x128xbf16>, vector<128x32xbf16>, vector<8x32xf32> -> vector<8x32xf32>
    %c2 = arith.constant 2 : index
    %c0_174 = arith.constant 0 : index
    %367 = vector.load %arg5[%c2, %c0_174] : memref<8x32xf32, #tpu.memory_space<vmem>>, vector<1x32xf32>
    %368 = vector.broadcast %367 : vector<1x32xf32> to vector<8x32xf32>
    %369 = arith.addf %366, %368 : vector<8x32xf32>
    %370 = arith.addf %369, %5 : vector<8x32xf32>
    %c3 = arith.constant 3 : index
    %c0_175 = arith.constant 0 : index
    %371 = vector.load %arg5[%c3, %c0_175] : memref<8x32xf32, #tpu.memory_space<vmem>>, vector<1x32xf32>
    %c4 = arith.constant 4 : index
    %c0_176 = arith.constant 0 : index
    %372 = vector.load %arg5[%c4, %c0_176] : memref<8x32xf32, #tpu.memory_space<vmem>>, vector<1x32xf32>
    %cst_177 = arith.constant dense<0.000000e+00> : vector<8xf32>
    %373 = vector.multi_reduction <add>, %370, %cst_177 [1] : vector<8x32xf32> to vector<8xf32>
    %374 = vector.shape_cast %373 : vector<8xf32> to vector<8x1xf32>
    %cst_178 = arith.constant 3.200000e+01 : f32
    %375 = vector.broadcast %cst_178 : f32 to vector<8x1xf32>
    %376 = arith.divf %374, %375 : vector<8x1xf32>
    %377 = vector.broadcast %376 : vector<8x1xf32> to vector<8x32xf32>
    %378 = arith.subf %370, %377 : vector<8x32xf32>
    %379 = arith.mulf %378, %378 : vector<8x32xf32>
    %cst_179 = arith.constant dense<0.000000e+00> : vector<8xf32>
    %380 = vector.multi_reduction <add>, %379, %cst_179 [1] : vector<8x32xf32> to vector<8xf32>
    %381 = vector.shape_cast %380 : vector<8xf32> to vector<8x1xf32>
    %cst_180 = arith.constant 3.200000e+01 : f32
    %382 = vector.broadcast %cst_180 : f32 to vector<8x1xf32>
    %383 = arith.divf %381, %382 : vector<8x1xf32>
    %384 = vector.broadcast %376 : vector<8x1xf32> to vector<8x32xf32>
    %385 = arith.subf %370, %384 : vector<8x32xf32>
    %cst_181 = arith.constant 9.99999974E-6 : f32
    %386 = vector.broadcast %cst_181 : f32 to vector<8x1xf32>
    %387 = arith.addf %383, %386 : vector<8x1xf32>
    %388 = math.rsqrt %387 : vector<8x1xf32>
    %389 = vector.broadcast %388 : vector<8x1xf32> to vector<8x32xf32>
    %390 = arith.mulf %385, %389 : vector<8x32xf32>
    %391 = vector.broadcast %371 : vector<1x32xf32> to vector<8x32xf32>
    %392 = arith.mulf %390, %391 : vector<8x32xf32>
    %393 = vector.broadcast %372 : vector<1x32xf32> to vector<8x32xf32>
    %394 = arith.addf %392, %393 : vector<8x32xf32>
    %395 = arith.truncf %394 : vector<8x32xf32> to vector<8x32xbf16>
    %c0_182 = arith.constant 0 : index
    %c0_183 = arith.constant 0 : index
    %396 = vector.load %arg9[%c0_182, %c0_183] : memref<32x64xbf16, #tpu.memory_space<vmem>>, vector<32x64xbf16>
    %cst_184 = arith.constant dense<0.000000e+00> : vector<8x64xf32>
    %397 = tpu.matmul %395, %396, %cst_184 {dimension_numbers = #tpu.dot_dimension_numbers<[1], [0], [0], [1], [0, 0, 1, 1], [], []>} : vector<8x32xbf16>, vector<32x64xbf16>, vector<8x64xf32> -> vector<8x64xf32>
    %c0_185 = arith.constant 0 : index
    %c0_186 = arith.constant 0 : index
    %398 = vector.load %arg10[%c0_185, %c0_186] : memref<1x64xf32, #tpu.memory_space<vmem>>, vector<1x64xf32>
    %399 = vector.broadcast %398 : vector<1x64xf32> to vector<8x64xf32>
    %400 = arith.addf %397, %399 : vector<8x64xf32>
    %cst_187 = arith.constant 5.000000e-01 : f32
    %401 = vector.broadcast %cst_187 : f32 to vector<8x64xf32>
    %402 = arith.mulf %401, %400 : vector<8x64xf32>
    %cst_188 = arith.constant 0.707106769 : f32
    %403 = vector.broadcast %cst_188 : f32 to vector<8x64xf32>
    %404 = arith.mulf %400, %403 : vector<8x64xf32>
    %405 = math.absf %404 : vector<8x64xf32>
    %cst_189 = arith.constant 0.327591091 : f32
    %406 = vector.broadcast %cst_189 : f32 to vector<8x64xf32>
    %407 = arith.mulf %406, %405 : vector<8x64xf32>
    %cst_190 = arith.constant 1.000000e+00 : f32
    %408 = vector.broadcast %cst_190 : f32 to vector<8x64xf32>
    %409 = arith.addf %408, %407 : vector<8x64xf32>
    %cst_191 = arith.constant 1.000000e+00 : f32
    %410 = vector.broadcast %cst_191 : f32 to vector<8x64xf32>
    %411 = arith.divf %410, %409 : vector<8x64xf32>
    %cst_192 = arith.constant 1.06140542 : f32
    %412 = vector.broadcast %cst_192 : f32 to vector<8x64xf32>
    %413 = arith.mulf %412, %411 : vector<8x64xf32>
    %cst_193 = arith.constant -1.45315206 : f32
    %414 = vector.broadcast %cst_193 : f32 to vector<8x64xf32>
    %415 = arith.addf %413, %414 : vector<8x64xf32>
    %416 = arith.mulf %415, %411 : vector<8x64xf32>
    %cst_194 = arith.constant 1.42141378 : f32
    %417 = vector.broadcast %cst_194 : f32 to vector<8x64xf32>
    %418 = arith.addf %416, %417 : vector<8x64xf32>
    %419 = arith.mulf %418, %411 : vector<8x64xf32>
    %cst_195 = arith.constant -0.284496725 : f32
    %420 = vector.broadcast %cst_195 : f32 to vector<8x64xf32>
    %421 = arith.addf %419, %420 : vector<8x64xf32>
    %422 = arith.mulf %421, %411 : vector<8x64xf32>
    %cst_196 = arith.constant 0.254829586 : f32
    %423 = vector.broadcast %cst_196 : f32 to vector<8x64xf32>
    %424 = arith.addf %422, %423 : vector<8x64xf32>
    %425 = arith.mulf %424, %411 : vector<8x64xf32>
    %cst_197 = arith.constant 0.000000e+00 : f32
    %426 = vector.broadcast %cst_197 : f32 to vector<8x64xf32>
    %427 = arith.subf %426, %405 : vector<8x64xf32>
    %428 = arith.mulf %427, %405 : vector<8x64xf32>
    %429 = math.exp %428 : vector<8x64xf32>
    %430 = arith.mulf %425, %429 : vector<8x64xf32>
    %cst_198 = arith.constant 1.000000e+00 : f32
    %431 = vector.broadcast %cst_198 : f32 to vector<8x64xf32>
    %432 = arith.subf %431, %430 : vector<8x64xf32>
    %cst_199 = arith.constant 0.000000e+00 : f32
    %433 = vector.broadcast %cst_199 : f32 to vector<8x64xf32>
    %434 = arith.cmpf oge, %404, %433 : vector<8x64xf32>
    %cst_200 = arith.constant 0.000000e+00 : f32
    %435 = vector.broadcast %cst_200 : f32 to vector<8x64xf32>
    %436 = arith.subf %435, %432 : vector<8x64xf32>
    %437 = arith.select %434, %432, %436 : vector<8x64xi1>, vector<8x64xf32>
    %cst_201 = arith.constant 1.000000e+00 : f32
    %438 = vector.broadcast %cst_201 : f32 to vector<8x64xf32>
    %439 = arith.addf %438, %437 : vector<8x64xf32>
    %440 = arith.mulf %402, %439 : vector<8x64xf32>
    %441 = arith.truncf %440 : vector<8x64xf32> to vector<8x64xbf16>
    %c0_202 = arith.constant 0 : index
    %c0_203 = arith.constant 0 : index
    %442 = vector.load %arg11[%c0_202, %c0_203] : memref<64x32xbf16, #tpu.memory_space<vmem>>, vector<64x32xbf16>
    %cst_204 = arith.constant dense<0.000000e+00> : vector<8x32xf32>
    %443 = tpu.matmul %441, %442, %cst_204 {dimension_numbers = #tpu.dot_dimension_numbers<[1], [0], [0], [1], [0, 0, 1, 1], [], []>} : vector<8x64xbf16>, vector<64x32xbf16>, vector<8x32xf32> -> vector<8x32xf32>
    %c5 = arith.constant 5 : index
    %c0_205 = arith.constant 0 : index
    %444 = vector.load %arg5[%c5, %c0_205] : memref<8x32xf32, #tpu.memory_space<vmem>>, vector<1x32xf32>
    %445 = vector.broadcast %444 : vector<1x32xf32> to vector<8x32xf32>
    %446 = arith.addf %443, %445 : vector<8x32xf32>
    %447 = arith.addf %446, %370 : vector<8x32xf32>
    %448 = tpu.iota {dimensions = array<i32: 0>} : vector<2x8xi32>
    %c0_206 = arith.constant 0 : index
    %c0_207 = arith.constant 0 : index
    %449 = vector.load %arg4[%c0_206, %c0_207] : memref<1x8xi32, #tpu.memory_space<vmem>>, vector<1x8xi32>
    %450 = vector.broadcast %449 : vector<1x8xi32> to vector<2x8xi32>
    %451 = arith.cmpi eq, %448, %450 : vector<2x8xi32>
    %452 = arith.extui %451 : vector<2x8xi1> to vector<2x8xi32>
    %453 = arith.sitofp %452 : vector<2x8xi32> to vector<2x8xf32>
    %cst_208 = arith.constant 2.500000e-01 : f32
    %454 = vector.broadcast %cst_208 : f32 to vector<2x8xf32>
    %455 = arith.mulf %453, %454 : vector<2x8xf32>
    %cst_209 = arith.constant dense<0.000000e+00> : vector<2x32xf32>
    %456 = tpu.matmul %455, %447, %cst_209 {dimension_numbers = #tpu.dot_dimension_numbers<[1], [0], [0], [1], [0, 0, 1, 1], [], []>} : vector<2x8xf32>, vector<8x32xf32>, vector<2x32xf32> -> vector<2x32xf32>
    %c6 = arith.constant 6 : index
    %c0_210 = arith.constant 0 : index
    %457 = vector.load %arg5[%c6, %c0_210] : memref<8x32xf32, #tpu.memory_space<vmem>>, vector<1x32xf32>
    %c7 = arith.constant 7 : index
    %c0_211 = arith.constant 0 : index
    %458 = vector.load %arg5[%c7, %c0_211] : memref<8x32xf32, #tpu.memory_space<vmem>>, vector<1x32xf32>
    %cst_212 = arith.constant dense<0.000000e+00> : vector<2xf32>
    %459 = vector.multi_reduction <add>, %456, %cst_212 [1] : vector<2x32xf32> to vector<2xf32>
    %460 = vector.shape_cast %459 : vector<2xf32> to vector<2x1xf32>
    %cst_213 = arith.constant 3.200000e+01 : f32
    %461 = vector.broadcast %cst_213 : f32 to vector<2x1xf32>
    %462 = arith.divf %460, %461 : vector<2x1xf32>
    %463 = vector.broadcast %462 : vector<2x1xf32> to vector<2x32xf32>
    %464 = arith.subf %456, %463 : vector<2x32xf32>
    %465 = arith.mulf %464, %464 : vector<2x32xf32>
    %cst_214 = arith.constant dense<0.000000e+00> : vector<2xf32>
    %466 = vector.multi_reduction <add>, %465, %cst_214 [1] : vector<2x32xf32> to vector<2xf32>
    %467 = vector.shape_cast %466 : vector<2xf32> to vector<2x1xf32>
    %cst_215 = arith.constant 3.200000e+01 : f32
    %468 = vector.broadcast %cst_215 : f32 to vector<2x1xf32>
    %469 = arith.divf %467, %468 : vector<2x1xf32>
    %470 = vector.broadcast %462 : vector<2x1xf32> to vector<2x32xf32>
    %471 = arith.subf %456, %470 : vector<2x32xf32>
    %cst_216 = arith.constant 9.99999974E-6 : f32
    %472 = vector.broadcast %cst_216 : f32 to vector<2x1xf32>
    %473 = arith.addf %469, %472 : vector<2x1xf32>
    %474 = math.rsqrt %473 : vector<2x1xf32>
    %475 = vector.broadcast %474 : vector<2x1xf32> to vector<2x32xf32>
    %476 = arith.mulf %471, %475 : vector<2x32xf32>
    %477 = vector.broadcast %457 : vector<1x32xf32> to vector<2x32xf32>
    %478 = arith.mulf %476, %477 : vector<2x32xf32>
    %479 = vector.broadcast %458 : vector<1x32xf32> to vector<2x32xf32>
    %480 = arith.addf %478, %479 : vector<2x32xf32>
    %481 = arith.truncf %480 : vector<2x32xf32> to vector<2x32xbf16>
    %c0_217 = arith.constant 0 : index
    %c0_218 = arith.constant 0 : index
    %482 = vector.load %arg12[%c0_217, %c0_218] : memref<32x16xbf16, #tpu.memory_space<vmem>>, vector<32x16xbf16>
    %cst_219 = arith.constant dense<0.000000e+00> : vector<2x16xf32>
    %483 = tpu.matmul %481, %482, %cst_219 {dimension_numbers = #tpu.dot_dimension_numbers<[1], [0], [0], [1], [0, 0, 1, 1], [], []>} : vector<2x32xbf16>, vector<32x16xbf16>, vector<2x16xf32> -> vector<2x16xf32>
    %c0_220 = arith.constant 0 : index
    %c0_221 = arith.constant 0 : index
    %484 = vector.load %arg13[%c0_220, %c0_221] : memref<1x16xf32, #tpu.memory_space<vmem>>, vector<1x16xf32>
    %485 = vector.broadcast %484 : vector<1x16xf32> to vector<2x16xf32>
    %486 = arith.addf %483, %485 : vector<2x16xf32>
    %c0_222 = arith.constant 0 : index
    %c0_223 = arith.constant 0 : index
    %487 = vector.load %arg14[%c0_222, %c0_223] : memref<2x16xf32, #tpu.memory_space<vmem>>, vector<2x16xf32>
    tpu.vector_store %arg14[%c0_222, %c0_223], %486 {strides = array<i32>} : memref<2x16xf32, #tpu.memory_space<vmem>>, vector<2x16xf32>,
    return
  }
  func.func @transform_0(%arg0: i32) -> (i32, i32) {
    %c0_i32 = arith.constant 0 : i32
    %c0_i32_0 = arith.constant 0 : i32
    return %arg0, %c0_i32 : i32, i32
  }
  func.func @transform_1(%arg0: i32) -> (i32, i32) {
    %c0_i32 = arith.constant 0 : i32
    %c0_i32_0 = arith.constant 0 : i32
    %c0_i32_1 = arith.constant 0 : i32
    return %c0_i32, %c0_i32_0 : i32, i32
  }
  func.func @transform_2(%arg0: i32) -> (i32, i32) {
    %c0_i32 = arith.constant 0 : i32
    %c0_i32_0 = arith.constant 0 : i32
    %c0_i32_1 = arith.constant 0 : i32
    return %c0_i32, %c0_i32_0 : i32, i32
  }
  func.func @transform_3(%arg0: i32) -> (i32, i32) {
    %c0_i32 = arith.constant 0 : i32
    %c0_i32_0 = arith.constant 0 : i32
    %c0_i32_1 = arith.constant 0 : i32
    return %c0_i32, %c0_i32_0 : i32, i32
  }
  func.func @transform_4(%arg0: i32) -> (i32, i32) {
    %c0_i32 = arith.constant 0 : i32
    %c0_i32_0 = arith.constant 0 : i32
    %c0_i32_1 = arith.constant 0 : i32
    return %c0_i32, %c0_i32_0 : i32, i32
  }
  func.func @transform_5(%arg0: i32) -> (i32, i32) {
    %c0_i32 = arith.constant 0 : i32
    %c0_i32_0 = arith.constant 0 : i32
    %c0_i32_1 = arith.constant 0 : i32
    return %c0_i32, %c0_i32_0 : i32, i32
  }
  func.func @transform_6(%arg0: i32) -> (i32, i32) {
    %c0_i32 = arith.constant 0 : i32
    %c0_i32_0 = arith.constant 0 : i32
    %c0_i32_1 = arith.constant 0 : i32
    return %c0_i32, %c0_i32_0 : i32, i32
  }
  func.func @transform_7(%arg0: i32) -> (i32, i32) {
    %c0_i32 = arith.constant 0 : i32
    %c0_i32_0 = arith.constant 0 : i32
    %c0_i32_1 = arith.constant 0 : i32
    return %c0_i32, %c0_i32_0 : i32, i32
  }
  func.func @transform_8(%arg0: i32) -> (i32, i32) {
    %c0_i32 = arith.constant 0 : i32
    %c0_i32_0 = arith.constant 0 : i32
    %c0_i32_1 = arith.constant 0 : i32
    return %c0_i32, %c0_i32_0 : i32, i32
  }
  func.func @transform_9(%arg0: i32) -> (i32, i32) {
    %c0_i32 = arith.constant 0 : i32
    %c0_i32_0 = arith.constant 0 : i32
    %c0_i32_1 = arith.constant 0 : i32
    return %c0_i32, %c0_i32_0 : i32, i32
  }
  func.func @transform_10(%arg0: i32) -> (i32, i32) {
    %c0_i32 = arith.constant 0 : i32
    %c0_i32_0 = arith.constant 0 : i32
    %c0_i32_1 = arith.constant 0 : i32
    return %c0_i32, %c0_i32_0 : i32, i32
  }
  func.func @transform_11(%arg0: i32) -> (i32, i32) {
    %c0_i32 = arith.constant 0 : i32
    %c0_i32_0 = arith.constant 0 : i32
    %c0_i32_1 = arith.constant 0 : i32
    return %c0_i32, %c0_i32_0 : i32, i32
  }
  func.func @transform_12(%arg0: i32) -> (i32, i32) {
    %c0_i32 = arith.constant 0 : i32
    %c0_i32_0 = arith.constant 0 : i32
    %c0_i32_1 = arith.constant 0 : i32
    return %c0_i32, %c0_i32_0 : i32, i32
  }
  func.func @transform_13(%arg0: i32) -> (i32, i32) {
    %c0_i32 = arith.constant 0 : i32
    %c0_i32_0 = arith.constant 0 : i32
    return %arg0, %c0_i32 : i32, i32
  }
}

</mosaic_0001>

<bundles_post_ra>
// kernel: tpu_custom_call.1
= control target key start
LH: loop header
LB: loop body
LE: loop exit
PB: predicated region body
PF: predicated region fallthrough
CT: control target
= control target key end

     0   :  { %v3570_v1 = vmov 0.0   ;;  %vm3571_vm0 = vmmov 0   ;;  %vm65_vm1 = vcmask 261120   ;;  %s4189_s0 = inlined_call_operand.vmem [shape: f32[8,32], index: 0, kind: input, shape index: {}]   ;;  %s4190_s1 = inlined_call_operand.vmem [shape: f32[8,32], index: 1, kind: input, shape index: {}]   ;;  %s4191_s2 = inlined_call_operand.vmem [shape: s32[8,1], index: 2, kind: input, shape index: {}]   ;;  %s4192_s3 = inlined_call_operand.vmem [shape: s32[1,8], index: 3, kind: input, shape index: {}]   ;;  %s4193_s4 = inlined_call_operand.vmem [shape: f32[8,32], index: 4, kind: input, shape index: {}]   ;;  %s4194_s5 = inlined_call_operand.vmem [shape: bf16[32,32], index: 5, kind: input, shape index: {}]   ;;  %s4195_s6 = inlined_call_operand.vmem [shape: bf16[32,384], index: 6, kind: input, shape index: {}]   ;;  %s4196_s7 = inlined_call_operand.vmem [shape: bf16[128,32], index: 7, kind: input, shape index: {}]   ;;  %s4197_s8 = inlined_call_operand.vmem [shape: bf16[32,64], index: 8, kind: input, shape index: {}]   ;;  %s4198_s9 = inlined_call_operand.vmem [shape: f32[1,64], index: 9, kind: input, shape index: {}]   ;;  %s4199_s10 = inlined_call_operand.vmem [shape: bf16[64,32], index: 10, kind: input, shape index: {}]   ;;  %s4200_s11 = inlined_call_operand.vmem [shape: bf16[32,16], index: 11, kind: input, shape index: {}]   ;;  %s4201_s12 = inlined_call_operand.vmem [shape: f32[1,16], index: 12, kind: input, shape index: {}]   ;;  %s4202_s13 = inlined_call_operand.hbm [shape: f32[2,16], index: 13, kind: output, shape index: {}]  }
   0x1   :  { %v3401_v0 = vld [vmem:[%s4194_s5] sm:$0xff]   ;;  %3118 = vmatprep.subr.bf16.mxu0 %v3570_v1  ;;  %v3402_v2 = vld [vmem:[%s4194_s5 + $0x8] sm:$0xff]   ;;  %3122 = vmatprep.mubr.msk.bf16.mxu0 %vm3571_vm0, %v3570_v1 }
   0x2   :  { %3119 = vmatpush3.bf16.msra.mxu0 %v3401_v0  ;;  %v46_v3 = vld [vmem:[%s4189_s0] sm:$0xff] }
   0x3   :  { %3120 = vmatprep.subr.bf16.mxu0 %v3570_v1  ;;  %v47_v4 = vpack.c.bf16 %v46_v3, %v46_v3 }
   0x6   :  { %3121 = vmatpush3.bf16.msra.mxu0 %v3402_v2 }
   0x7   :  { %3126 = vmatprep.subr.bf16.mxu0 %v3570_v1 }
   0x9   :  { %3123 = vmatmul.mubr.msk.bf16.vlgmr.msra.gmra.mrb[0].mxu0 %vm65_vm1, %v47_v4 }
   0xa   :  { %3130 = vmatprep.mubr.msk.bf16.mxu0 %vm3571_vm0, %v3570_v1 }
   0xb   :  { %18 = vsyncpa [#allocation5], 0  ;;  %v52_v5 = vld [vmem:[%s4190_s1] sm:$0xff]  ;;  %v3406_v19 = vld [vmem:[%s4195_s6 + $0x8] ss:$12 sps:$4 sm:$0xff]   ;;  %v3572_v23 = vmov 0  }
   0xc   :  { %v3403_v17 = vld [vmem:[%s4195_s6 + $0x4] ss:$12 sps:$4 sm:$0xff]   ;;  %v3405_v18 = vld [vmem:[%s4195_s6] ss:$12 sps:$4 sm:$0xff]   ;;  %v3407_v20 = vld [vmem:[%s4195_s6 + $0x1c] ss:$12 sps:$4 sm:$0xff]   ;;  %3127 = vmatpush3.bf16.msra.mxu0 %v3406_v19  ;;  %211 = vmatprep.mubr.bf16.mxu1 %v3572_v23 }
   0xd   :  { %179 = vmatprep.subr.bf16.mxu1 %v3403_v17  ;;  %v3410_v21 = vld [vmem:[%s4195_s6 + $0x20] ss:$12 sps:$4 sm:$0xff]   ;;  %3128 = vmatprep.subr.bf16.mxu0 %v3570_v1  ;;  %v3409_v22 = vld [vmem:[%s4195_s6 + $0x18] ss:$12 sps:$4 sm:$0xff]   ;;  %vm351_vm2 = vcmask 1043456   ;;  %vm291_vm3 = vcmask 64512  }
   0xe   :  { %180 = vmatpush1.bf16.msra.mxu1 %v3405_v18  ;;  %3399 = vset.pattern.permute.xlu1 %v3572_v23  ;;  %v2874_v28 = vld [vmem:[%s4193_s4] ss:$0 sm:$0xff]  ;;  %v2875_v30 = vld [vmem:[%s4193_s4 + $0x1] ss:$0 sm:$0xff]  ;;  %s3573_s28 = smov 112   ;;  %s3574_s29 = smov 120  }
   0xf   :  { %181 = vmatprep.subr.bf16.mxu1 %v3407_v20  ;;  %3400 = vset.pattern.permute.xlu0 %v3572_v23  ;;  %s3575_s30 = smov 88   ;;  %s3576_s5 = smov 80   ;;  %v275_v19 = vld [vmem:[%s4191_s2] sm:$0xff]  ;;  %vm398_vm5 = vcmask 60416   ;;  %vm529_vm6 = vcmask 126016   ;;  %vm660_vm7 = vcmask 191616  }
  0x10   :  { %3129 = vmatpush3.bf16.msra.mxu0 %v3410_v21  ;;  %s3577_s14 = smov 72   ;;  %s3578_s0 = smov 104   ;;  %vm791_vm8 = vcmask 257216   ;;  %vm922_vm9 = vcmask 322816   ;;  %vm1053_vm10 = vcmask 388416   ;;  %vm1184_vm11 = vcmask 454016  }
  0x11   :  { %3140 = vmatprep.subr.bf16.mxu0 %v3570_v1  ;;  %s3579_s1 = smov 64   ;;  %s3580_s15 = smov 56   ;;  %vm1315_vm12 = vcmask 519616   ;;  %vm1446_vm13 = vcmask 585216   ;;  %vm1577_vm14 = vcmask 650816   ;;  %vm1708_vm15 = vcmask 716416  }
  0x12   :  { %182 = vmatpush1.bf16.msra.mxu1 %v3409_v22  ;;  %s3581_s16 = smov 96   ;;  %s3582_s17 = smov 48  }
  0x13   :  { %3134 = vmatprep.subr.bf16.mxu1 %v3570_v1  ;;  %s3583_s18 = smov 40   ;;  %s3584_s19 = smov 32  }
  0x14   :  { %s3585_s20 = smov 24   ;;  %s3586_s21 = smov 16  }
  0x15   :  { %s3587_s22 = smov 8   ;;  %s3589_s25 = smov [#allocation4]  }
  0x16   :  { %s2863_s26 = sshll.u32 %s3589_s25, 4  ;;  %s2864_s26 = int_to_ptr.vmem [resolvable:$true] %s2863_s26 }
  0x17   :  { %p3551_p1 = scmp.lt.s32.totalorder %s2864_s26, %s2864_s26 }
  0xdc   :  { %v103_v6 = vpop.f32.mrb[0].mxu0 }
  0xdd   :  { %v3680_v7 = vadd.f32 %v103_v6, %v52_v5  ;;  %v3124_v8 = vpop.f32.mrb[1].mxu0 }
  0xde   :  { %v106_v9 = vpop.f32.mrb[2].mxu0 }
  0xdf   :  { %v3125_v10 = vpop.f32.mrb[3].mxu0  ;;  %v111_v11 = vsel %vm65_vm1, %v3680_v7, 0.0 }
  0xe0   :  { %112 = vadd.xlane.f32.xlu0 %v111_v11 }
 0x16d   :  { %v113_v12 = vpop.xlane.xlu0 %112 }
 0x16e   :  { %v115_v13 = vmul.f32 0.03125, %v113_v12 }
 0x170   :  { %v116_v14 = vsub.f32 %v3680_v7, %v115_v13 }
 0x172   :  { %v117_v15 = vmul.f32 %v116_v14, %v116_v14 }
 0x174   :  { %v118_v16 = vsel %vm65_vm1, %v117_v15, 0.0 }
 0x175   :  { %119 = vadd.xlane.f32.xlu0 %v118_v16 }
 0x202   :  { %v120_v24 = vpop.xlane.xlu0 %119 }
 0x203   :  { %v121_v25 = vmul.f32 0.03125, %v120_v24 }
 0x205   :  { %v122_v26 = vadd.f32 1e-05, %v121_v25 }
 0x207   :  { %3472 = vrsqrt.f32 %v122_v26 }
 0x211   :  { %v3473_v27 = vpop.eup %3472 }
 0x212   :  { %v124_v29 = vmul.f32 %v3473_v27, %v116_v14 }
 0x214   :  { %v129_v31 = vmul.f32 %v2874_v28, %v124_v29 }
 0x216   :  { %v134_v32 = vadd.f32 %v2875_v30, %v129_v31 }
 0x218   :  { %v135_v33 = vpack.c.bf16 %v134_v32, %v134_v32 }
 0x21a   :  { %2882 = vmatmul.mubr.msk.bf16.vlgmr.msra.gmra.mrb[0].mxu1 %vm65_vm1, %v135_v33  ;;  %3131 = vmatmul.mubr.msk.bf16.vlgmr.msra.gmra.mrb[4].mxu0 %vm65_vm1, %v135_v33 }
 0x21b   :  { %3136 = vmatprep.mubr.msk.bf16.mxu1 %vm3571_vm0, %v3570_v1  ;;  %3142 = vmatprep.mubr.msk.bf16.mxu0 %vm3571_vm0, %v3570_v1 }
 0x2ed   :  { %v213_v34 = vpop.f32.mrb[0].mxu1  ;;  %v254_v35 = vpop.f32.mrb[4].mxu0 }
 0x2ee   :  { %v3010_v36 = vpack.c.bf16 %v254_v35, %v254_v35  ;;  %v215_v37 = vpop.f32.mrb[1].mxu1  ;;  %v3132_v38 = vpop.f32.mrb[5].mxu0 }
 0x2ef   :  { %v3009_v39 = vpack.c.bf16 %v215_v37, %v213_v34  ;;  %v217_v40 = vpop.f32.mrb[2].mxu1  ;;  %v257_v41 = vpop.f32.mrb[6].mxu0 }
 0x2f0   :  { %274 = vst [vmem:[#allocation2 + $0x8] sm:$0xf] %v3010_v36  ;;  %v218_v42 = vpop.f32.mrb[3].mxu1  ;;  %v3133_v43 = vpop.f32.mrb[7].mxu0 }
 0x2f1   :  { %273 = vst [vmem:[#allocation2] sm:$0xff] %v3009_v39 }
 0x2f7   :  { %v289_v44 = vld [vmem:[#allocation2 + $0x8] sm:$0xf] }
 0x2f8   :  { %v353_v45 = vsel %vm351_vm2, %v289_v44, 0  ;;  %v288_v46 = vld [vmem:[#allocation2 + $0x4] sm:$0xf]  ;;  %v3413_v50 = vld [vmem:[#allocation2] ss:$0 sps:$4 sm:$0xff]  }
 0x2f9   :  { %3141 = vmatpush3.bf16.msra.mxu0 %v353_v45  ;;  %v296_v47 = vsel %vm291_vm3, %v288_v46, 0  ;;  %v3411_v48 = vld [vmem:[#allocation2 + $0x4] ss:$0 sps:$4 sm:$0xff]   ;;  %v3414_v51 = vld [vmem:[#allocation2] ss:$0 sps:$4 sm:$0xff]  }
 0x2fa   :  { %3135 = vmatpush3.bf16.xpose.msra.mxu1 %v296_v47  ;;  %v3412_v49 = vld [vmem:[#allocation2 + $0x4] ss:$0 sps:$4 sm:$0xff]   ;;  %3152 = vmatprep.subr.bf16.mxu0 %v3570_v1  ;;  %v287_v52 = vld [vmem:[#allocation2] sm:$0xf]  ;;  %v3436_v11 = vld [vmem:[#allocation2 + $0x8] ss:$0 sps:$4 sm:$0xff]  }
 0x2fb   :  { %542 = vrot.lane.b32.xlu0 %v3411_v48, %s3573_s28  ;;  %3146 = vmatprep.subr.bf16.mxu1 %v3570_v1  ;;  %v3415_v53 = vld [vmem:[#allocation2] ss:$0 sps:$4 sm:$0xff]   ;;  %v3418_v56 = vld [vmem:[#allocation2 + $0x4] ss:$0 sps:$4 sm:$0xff]   ;;  %v3438_v13 = vld [vmem:[#allocation2 + $0x8] ss:$0 sps:$4 sm:$0xff]  }
 0x2fc   :  { %411 = vrot.lane.b32.xlu1 %v3412_v49, %s3574_s29  ;;  %v3416_v54 = vld [vmem:[#allocation2] ss:$0 sps:$4 sm:$0xff]   ;;  %v3422_v60 = vld [vmem:[#allocation2 + $0x4] ss:$0 sps:$4 sm:$0xff]   ;;  %v3443_v20 = vld [vmem:[#allocation2 + $0x8] ss:$0 sps:$4 sm:$0xff]  }
 0x2fd   :  { %v3417_v55 = vld [vmem:[#allocation2] ss:$0 sps:$4 sm:$0xff]   ;;  %v3426_v0 = vld [vmem:[#allocation2 + $0x4] ss:$0 sps:$4 sm:$0xff]   ;;  %v3444_v21 = vld [vmem:[#allocation2 + $0x8] ss:$0 sps:$4 sm:$0xff]  }
 0x2fe   :  { %v3419_v57 = vld [vmem:[#allocation2] ss:$0 sps:$4 sm:$0xff]   ;;  %v3428_v3 = vld [vmem:[#allocation2 + $0x4] ss:$0 sps:$4 sm:$0xff]   ;;  %v3445_v22 = vld [vmem:[#allocation2 + $0x8] ss:$0 sps:$4 sm:$0xff]  }
 0x2ff   :  { %930 = vrot.lane.b32.xlu0 %v3413_v50, %s3575_s30  ;;  %v3420_v58 = vld [vmem:[#allocation2] ss:$0 sps:$4 sm:$0xff]   ;;  %v3430_v5 = vld [vmem:[#allocation2 + $0x4] ss:$0 sps:$4 sm:$0xff]  }
 0x300   :  { %406 = vrot.lane.b32.xlu1 %v3414_v51, %s3574_s29  ;;  %v3421_v59 = vld [vmem:[#allocation2] ss:$0 sps:$4 sm:$0xff]   ;;  %v3432_v8 = vld [vmem:[#allocation2 + $0x4] ss:$0 sps:$4 sm:$0xff]  }
 0x301   :  { %3137 = vmatmul.mubr.msk.bf16.vlgmr.msra.gmra.mrb[4].mxu1 %vm291_vm3, %v287_v52  ;;  %v3423_v61 = vld [vmem:[#allocation2] ss:$0 sps:$4 sm:$0xff]   ;;  %v3434_v10 = vld [vmem:[#allocation2 + $0x4] ss:$0 sps:$4 sm:$0xff]  }
 0x302   :  { %3148 = vmatprep.mubr.msk.bf16.mxu1 %vm3571_vm0, %v3570_v1  ;;  %v3424_v62 = vld [vmem:[#allocation2] ss:$0 sps:$4 sm:$0xff]   ;;  %v3435_v12 = vld [vmem:[#allocation2 + $0x4] ss:$0 sps:$4 sm:$0xff]  }
 0x303   :  { %1061 = vrot.lane.b32.xlu0 %v3415_v53, %s3576_s5  ;;  %v3425_v63 = vld [vmem:[#allocation2] ss:$0 sps:$4 sm:$0xff]   ;;  %v3437_v14 = vld [vmem:[#allocation2 + $0x4] ss:$0 sps:$4 sm:$0xff]  }
 0x304   :  { %537 = vrot.lane.b32.xlu1 %v3416_v54, %s3573_s28  ;;  %v3427_v2 = vld [vmem:[#allocation2] ss:$0 sps:$4 sm:$0xff]   ;;  %v3439_v15 = vld [vmem:[#allocation2 + $0x4] ss:$0 sps:$4 sm:$0xff]  }
 0x305   :  { %v3429_v4 = vld [vmem:[#allocation2] ss:$0 sps:$4 sm:$0xff]   ;;  %v3440_v16 = vld [vmem:[#allocation2 + $0x4] ss:$0 sps:$4 sm:$0xff]  }
 0x306   :  { %v3431_v6 = vld [vmem:[#allocation2] ss:$0 sps:$4 sm:$0xff]   ;;  %v3441_v17 = vld [vmem:[#allocation2 + $0x4] ss:$0 sps:$4 sm:$0xff]  }
 0x307   :  { %1192 = vrot.lane.b32.xlu0 %v3417_v55, %s3577_s14  ;;  %v3433_v9 = vld [vmem:[#allocation2] ss:$0 sps:$4 sm:$0xff]   ;;  %v3442_v18 = vld [vmem:[#allocation2 + $0x4] ss:$0 sps:$4 sm:$0xff]  }
 0x308   :  { %673 = vrot.lane.b32.xlu1 %v3418_v56, %s3578_s0 }
 0x30b   :  { %1323 = vrot.lane.b32.xlu0 %v3419_v57, %s3579_s1 }
 0x30c   :  { %668 = vrot.lane.b32.xlu1 %v3420_v58, %s3578_s0 }
 0x30f   :  { %1454 = vrot.lane.b32.xlu0 %v3421_v59, %s3580_s15  ;;  %v2886_v59 = vld [vmem:[%s4192_s3] ss:$0 sm:$0xff] }
 0x310   :  { %804 = vrot.lane.b32.xlu1 %v3422_v60, %s3581_s16 }
 0x313   :  { %1585 = vrot.lane.b32.xlu0 %v3423_v61, %s3582_s17 }
 0x314   :  { %799 = vrot.lane.b32.xlu1 %v3424_v62, %s3581_s16 }
 0x317   :  { %1716 = vrot.lane.b32.xlu0 %v3425_v63, %s3583_s18  ;;  %v3588_v63 = vmov -1e+30  }
 0x318   :  { %935 = vrot.lane.b32.xlu1 %v3426_v0, %s3575_s30 }
 0x31b   :  { %1847 = vrot.lane.b32.xlu0 %v3427_v2, %s3584_s19 }
 0x31c   :  { %1066 = vrot.lane.b32.xlu1 %v3428_v3, %s3576_s5 }
 0x31f   :  { %1978 = vrot.lane.b32.xlu0 %v3429_v4, %s3585_s20 }
 0x320   :  { %1197 = vrot.lane.b32.xlu1 %v3430_v5, %s3577_s14 }
 0x323   :  { %2109 = vrot.lane.b32.xlu0 %v3431_v6, %s3586_s21 }
 0x324   :  { %1328 = vrot.lane.b32.xlu1 %v3432_v8, %s3579_s1 }
 0x327   :  { %2240 = vrot.lane.b32.xlu0 %v3433_v9, %s3587_s22 }
 0x328   :  { %1459 = vrot.lane.b32.xlu1 %v3434_v10, %s3580_s15 }
 0x32b   :  { %472 = vrot.lane.b32.xlu0 %v3436_v11, %s3574_s29 }
 0x32c   :  { %1590 = vrot.lane.b32.xlu1 %v3435_v12, %s3582_s17 }
 0x32f   :  { %865 = vrot.lane.b32.xlu0 %v3438_v13, %s3581_s16 }
 0x330   :  { %1721 = vrot.lane.b32.xlu1 %v3437_v14, %s3583_s18 }
 0x334   :  { %1852 = vrot.lane.b32.xlu1 %v3439_v15, %s3584_s19 }
 0x338   :  { %1983 = vrot.lane.b32.xlu1 %v3440_v16, %s3585_s20 }
 0x33c   :  { %2114 = vrot.lane.b32.xlu1 %v3441_v17, %s3586_s21 }
 0x340   :  { %2245 = vrot.lane.b32.xlu1 %v3442_v18, %s3587_s22 }
 0x344   :  { %278 = vperm.xlu1 %3399, %v275_v19  }
 0x348   :  { %603 = vrot.lane.b32.xlu1 %v3443_v20, %s3573_s28 }
 0x34c   :  { %734 = vrot.lane.b32.xlu1 %v3444_v21, %s3578_s0 }
 0x350   :  { %996 = vrot.lane.b32.xlu1 %v3445_v22, %s3575_s30 }
 0x36d   :  { %v543_v26 = vpop.permute.xlu0 %542 }
 0x36e   :  { %v412_v23 = vpop.permute.xlu1 %411  ;;  %v548_v28 = vsel %vm291_vm3, %v543_v26, 0 }
 0x36f   :  { %v417_v24 = vsel %vm291_vm3, %v412_v23, 0 }
 0x370   :  { %3147 = vmatpush3.bf16.xpose.msra.mxu1 %v417_v24 }
 0x371   :  { %3158 = vmatprep.subr.bf16.mxu1 %v3570_v1  ;;  %v931_v39 = vpop.permute.xlu0 %930 }
 0x372   :  { %v407_v25 = vpop.permute.xlu1 %406 }
 0x375   :  { %v1062_v42 = vpop.permute.xlu0 %1061 }
 0x376   :  { %v538_v27 = vpop.permute.xlu1 %537 }
 0x377   :  { %3149 = vmatmul.mubr.msk.bf16.vlgmr.msra.gmra.mrb[8].mxu1 %vm291_vm3, %v407_v25 }
 0x378   :  { %3159 = vmatpush3.bf16.xpose.msra.mxu1 %v548_v28  ;;  %3160 = vmatprep.mubr.msk.bf16.mxu1 %vm3571_vm0, %v3570_v1 }
 0x379   :  { %3170 = vmatprep.subr.bf16.mxu1 %v3570_v1  ;;  %v1193_v46 = vpop.permute.xlu0 %1192 }
 0x37a   :  { %v674_v29 = vpop.permute.xlu1 %673 }
 0x37b   :  { %v679_v31 = vsel %vm291_vm3, %v674_v29, 0 }
 0x37d   :  { %v1324_v49 = vpop.permute.xlu0 %1323 }
 0x37e   :  { %v669_v30 = vpop.permute.xlu1 %668 }
 0x37f   :  { %3161 = vmatmul.mubr.msk.bf16.vlgmr.msra.gmra.mrb[12].mxu1 %vm291_vm3, %v538_v27 }
 0x380   :  { %3171 = vmatpush3.bf16.xpose.msra.mxu1 %v679_v31  ;;  %3172 = vmatprep.mubr.msk.bf16.mxu1 %vm3571_vm0, %v3570_v1 }
 0x381   :  { %3182 = vmatprep.subr.bf16.mxu1 %v3570_v1  ;;  %v1455_v52 = vpop.permute.xlu0 %1454 }
 0x382   :  { %v805_v32 = vpop.permute.xlu1 %804 }
 0x383   :  { %v810_v34 = vsel %vm291_vm3, %v805_v32, 0 }
 0x385   :  { %v1586_v56 = vpop.permute.xlu0 %1585 }
 0x386   :  { %v800_v33 = vpop.permute.xlu1 %799 }
 0x387   :  { %3173 = vmatmul.mubr.msk.bf16.vlgmr.msra.gmra.mrb[16].mxu1 %vm291_vm3, %v669_v30 }
 0x388   :  { %3183 = vmatpush3.bf16.xpose.msra.mxu1 %v810_v34  ;;  %3184 = vmatprep.mubr.msk.bf16.mxu1 %vm3571_vm0, %v3570_v1 }
 0x389   :  { %3194 = vmatprep.subr.bf16.mxu1 %v3570_v1  ;;  %v1717_v60 = vpop.permute.xlu0 %1716 }
 0x38a   :  { %v936_v35 = vpop.permute.xlu1 %935 }
 0x38b   :  { %v941_v37 = vsel %vm291_vm3, %v936_v35, 0 }
 0x38d   :  { %v1848_v3 = vpop.permute.xlu0 %1847 }
 0x38e   :  { %v1067_v36 = vpop.permute.xlu1 %1066 }
 0x38f   :  { %3185 = vmatmul.mubr.msk.bf16.vlgmr.msra.gmra.mrb[20].mxu1 %vm291_vm3, %v800_v33  ;;  %v1072_v40 = vsel %vm291_vm3, %v1067_v36, 0 }
 0x390   :  { %3195 = vmatpush3.bf16.xpose.msra.mxu1 %v941_v37  ;;  %3196 = vmatprep.mubr.msk.bf16.mxu1 %vm3571_vm0, %v3570_v1 }
 0x391   :  { %3206 = vmatprep.subr.bf16.mxu1 %v3570_v1  ;;  %v1979_v10 = vpop.permute.xlu0 %1978 }
 0x392   :  { %v1198_v38 = vpop.permute.xlu1 %1197 }
 0x393   :  { %v1203_v44 = vsel %vm291_vm3, %v1198_v38, 0 }
 0x395   :  { %v2110_v15 = vpop.permute.xlu0 %2109 }
 0x396   :  { %v1329_v41 = vpop.permute.xlu1 %1328 }
 0x397   :  { %3197 = vmatmul.mubr.msk.bf16.vlgmr.msra.gmra.mrb[24].mxu1 %vm291_vm3, %v931_v39  ;;  %v1334_v47 = vsel %vm291_vm3, %v1329_v41, 0 }
 0x398   :  { %3207 = vmatpush3.bf16.xpose.msra.mxu1 %v1072_v40  ;;  %3208 = vmatprep.mubr.msk.bf16.mxu1 %vm3571_vm0, %v3570_v1 }
 0x399   :  { %3218 = vmatprep.subr.bf16.mxu1 %v3570_v1  ;;  %v2241_v17 = vpop.permute.xlu0 %2240 }
 0x39a   :  { %v1460_v43 = vpop.permute.xlu1 %1459 }
 0x39b   :  { %v1465_v50 = vsel %vm291_vm3, %v1460_v43, 0 }
 0x39d   :  { %v473_v31 = vpop.permute.xlu0 %472 }
 0x39e   :  { %v1591_v45 = vpop.permute.xlu1 %1590 }
 0x39f   :  { %3209 = vmatmul.mubr.msk.bf16.vlgmr.msra.gmra.mrb[28].mxu1 %vm291_vm3, %v1062_v42  ;;  %v1596_v54 = vsel %vm291_vm3, %v1591_v45, 0 }
 0x3a0   :  { %3219 = vmatpush3.bf16.xpose.msra.mxu1 %v1203_v44  ;;  %3220 = vmatprep.mubr.msk.bf16.mxu1 %vm3571_vm0, %v3570_v1 }
 0x3a1   :  { %3230 = vmatprep.subr.bf16.mxu1 %v3570_v1  ;;  %v3861_v37 = vpop.permute.xlu0 %865 }
 0x3a2   :  { %v1722_v48 = vpop.permute.xlu1 %1721 }
 0x3a3   :  { %v1727_v57 = vsel %vm291_vm3, %v1722_v48, 0 }
 0x3a6   :  { %v1853_v51 = vpop.permute.xlu1 %1852 }
 0x3a7   :  { %3221 = vmatmul.mubr.msk.bf16.vlgmr.msra.gmra.mrb[32].mxu1 %vm291_vm3, %v1193_v46  ;;  %v1858_v62 = vsel %vm291_vm3, %v1853_v51, 0 }
 0x3a8   :  { %3231 = vmatpush3.bf16.xpose.msra.mxu1 %v1334_v47  ;;  %3232 = vmatprep.mubr.msk.bf16.mxu1 %vm3571_vm0, %v3570_v1 }
 0x3a9   :  { %3242 = vmatprep.subr.bf16.mxu1 %v3570_v1 }
 0x3aa   :  { %v1984_v53 = vpop.permute.xlu1 %1983 }
 0x3ab   :  { %v1989_v4 = vsel %vm291_vm3, %v1984_v53, 0 }
 0x3ae   :  { %v2115_v55 = vpop.permute.xlu1 %2114 }
 0x3af   :  { %3233 = vmatmul.mubr.msk.bf16.vlgmr.msra.gmra.mrb[36].mxu1 %vm291_vm3, %v1324_v49  ;;  %v2120_v12 = vsel %vm291_vm3, %v2115_v55, 0 }
 0x3b0   :  { %3243 = vmatpush3.bf16.xpose.msra.mxu1 %v1465_v50  ;;  %3244 = vmatprep.mubr.msk.bf16.mxu1 %vm3571_vm0, %v3570_v1 }
 0x3b1   :  { %3254 = vmatprep.subr.bf16.mxu1 %v3570_v1 }
 0x3b2   :  { %v2246_v58 = vpop.permute.xlu1 %2245 }
 0x3b3   :  { %v2251_v16 = vsel %vm291_vm3, %v2246_v58, 0 }
 0x3b7   :  { %3245 = vmatmul.mubr.msk.bf16.vlgmr.msra.gmra.mrb[40].mxu1 %vm291_vm3, %v1455_v52 }
 0x3b8   :  { %3255 = vmatpush3.bf16.xpose.msra.mxu1 %v1596_v54  ;;  %3256 = vmatprep.mubr.msk.bf16.mxu1 %vm3571_vm0, %v3570_v1 }
 0x3b9   :  { %3266 = vmatprep.subr.bf16.mxu1 %v3570_v1 }
 0x3bf   :  { %3257 = vmatmul.mubr.msk.bf16.vlgmr.msra.gmra.mrb[44].mxu1 %vm291_vm3, %v1586_v56 }
 0x3c0   :  { %3267 = vmatpush3.bf16.xpose.msra.mxu1 %v1727_v57  ;;  %3268 = vmatprep.mubr.msk.bf16.mxu1 %vm3571_vm0, %v3570_v1 }
 0x3c1   :  { %3278 = vmatprep.subr.bf16.mxu1 %v3570_v1 }
 0x3c3   :  { %v279_v61 = vpop.permute.xlu1 %278 }
 0x3c4   :  { %vm284_vm4 = vcmp.eq.s32.totalorder %v279_v61, %v2886_v59  ;;  %v478_v61 = vsel %vm351_vm2, %v473_v31, 0 }
 0x3c5   :  { %v285_v0 = vsel %vm284_vm4, 0.0, %v3588_v63  ;;  %vm1970_vm4 = vcmask 847616  }
 0x3c6   :  { %v286_v2 = vpack.c.bf16 %v285_v0, %v285_v0 }
 0x3c7   :  { %3269 = vmatmul.mubr.msk.bf16.vlgmr.msra.gmra.mrb[48].mxu1 %vm291_vm3, %v1717_v60 }
 0x3c8   :  { %3279 = vmatpush3.bf16.xpose.msra.mxu1 %v1858_v62  ;;  %3280 = vmatprep.mubr.msk.bf16.mxu1 %vm3571_vm0, %v3570_v1  ;;  %v3828_v5 = vunpack.c.l.bf16 %v286_v2 }
 0x3c9   :  { %3290 = vmatprep.subr.bf16.mxu1 %v3570_v1 }
 0x3cf   :  { %3281 = vmatmul.mubr.msk.bf16.vlgmr.msra.gmra.mrb[52].mxu1 %vm291_vm3, %v1848_v3 }
 0x3d0   :  { %3291 = vmatpush3.bf16.xpose.msra.mxu1 %v1989_v4  ;;  %3292 = vmatprep.mubr.msk.bf16.mxu1 %vm3571_vm0, %v3570_v1 }
 0x3d1   :  { %3302 = vmatprep.subr.bf16.mxu1 %v3570_v1 }
 0x3d4   :  { %v332_v6 = vpop.f32.mrb[4].mxu1 }
 0x3d5   :  { %v333_v8 = vadd.f32 %v332_v6, %v3828_v5  ;;  %v3138_v9 = vpop.f32.mrb[5].mxu1 }
 0x3d6   :  { %v335_v11 = vpop.f32.mrb[6].mxu1 }
 0x3d7   :  { %3293 = vmatmul.mubr.msk.bf16.vlgmr.msra.gmra.mrb[56].mxu1 %vm291_vm3, %v1979_v10  ;;  %v3139_v13 = vpop.f32.mrb[7].mxu1  ;;  %v338_v14 = vsel %vm291_vm3, %v333_v8, -inf }
 0x3d8   :  { %3303 = vmatpush3.bf16.xpose.msra.mxu1 %v2120_v12  ;;  %339 = vmax.xlane.f32.xlu0 %v338_v14  ;;  %v3446_v14 = vld [vmem:[#allocation2 + $0x8] ss:$0 sps:$4 sm:$0xff]  }
 0x3d9   :  { %3304 = vmatprep.mubr.msk.bf16.mxu1 %vm3571_vm0, %v3570_v1  ;;  %3314 = vmatprep.subr.bf16.mxu1 %v3570_v1 }
 0x3df   :  { %3305 = vmatmul.mubr.msk.bf16.vlgmr.msra.gmra.mrb[60].mxu1 %vm291_vm3, %v2110_v15 }
 0x3e0   :  { %3315 = vmatpush3.bf16.xpose.msra.mxu1 %v2251_v16  ;;  %3316 = vmatprep.mubr.msk.bf16.mxu1 %vm3571_vm0, %v3570_v1 }
 0x3e1   :  { %3326 = vmatprep.subr.bf16.mxu1 %v3570_v1 }
 0x3e7   :  { %3317 = vmatmul.mubr.msk.bf16.vlgmr.msra.gmra.mrb[64].mxu1 %vm291_vm3, %v2241_v17 }
 0x3e8   :  { %3342 = vmatprep.mubr.msk.bf16.mxu1 %vm3571_vm0, %v3570_v1 }
 0x44a   :  { %v453_v18 = vpop.f32.mrb[8].mxu1 }
 0x44b   :  { %v3847_v19 = vadd.f32 %v453_v18, %v3828_v5  ;;  %v3150_v20 = vpop.f32.mrb[9].mxu1  ;;  %v3447_v18 = vld [vmem:[#allocation2 + $0x8] ss:$0 sps:$4 sm:$0xff]  }
 0x44c   :  { %v456_v21 = vpop.f32.mrb[10].mxu1 }
 0x44d   :  { %v3151_v22 = vpop.f32.mrb[11].mxu1  ;;  %v459_v23 = vsel %vm291_vm3, %v3847_v19, -inf }
 0x44e   :  { %460 = vmax.xlane.f32.xlu1 %v459_v23 }
 0x452   :  { %v584_v24 = vpop.f32.mrb[12].mxu1 }
 0x453   :  { %v3852_v25 = vadd.f32 %v584_v24, %v3828_v5  ;;  %v3162_v26 = vpop.f32.mrb[13].mxu1  ;;  %v3448_v24 = vld [vmem:[#allocation2 + $0x8] ss:$0 sps:$4 sm:$0xff]  }
 0x454   :  { %v587_v27 = vpop.f32.mrb[14].mxu1 }
 0x455   :  { %v3163_v28 = vpop.f32.mrb[15].mxu1  ;;  %v590_v29 = vsel %vm291_vm3, %v3852_v25, -inf }
 0x456   :  { %591 = vmax.xlane.f32.xlu0 %v590_v29 }
 0x45a   :  { %v715_v30 = vpop.f32.mrb[16].mxu1 }
 0x45b   :  { %v3857_v32 = vadd.f32 %v715_v30, %v3828_v5  ;;  %v3174_v33 = vpop.f32.mrb[17].mxu1 }
 0x45c   :  { %v718_v34 = vpop.f32.mrb[18].mxu1 }
 0x45d   :  { %v3175_v35 = vpop.f32.mrb[19].mxu1  ;;  %v721_v36 = vsel %vm291_vm3, %v3857_v32, -inf }
 0x45e   :  { %722 = vmax.xlane.f32.xlu0 %v721_v36 }
 0x462   :  { %v846_v38 = vpop.f32.mrb[20].mxu1 }
 0x463   :  { %v3864_v39 = vadd.f32 %v846_v38, %v3828_v5  ;;  %v3186_v40 = vpop.f32.mrb[21].mxu1 }
 0x464   :  { %v849_v41 = vpop.f32.mrb[22].mxu1 }
 0x465   :  { %v3187_v42 = vpop.f32.mrb[23].mxu1  ;;  %v852_v43 = vsel %vm291_vm3, %v3864_v39, -inf  ;;  %v340_v44 = vpop.xlane.xlu0 %339 }
 0x466   :  { %853 = vmax.xlane.f32.xlu1 %v852_v43  ;;  %v341_v45 = vsub.f32 %v333_v8, %v340_v44 }
 0x468   :  { %v342_v46 = vmul.f32 1.442695, %v341_v45 }
 0x46a   :  { %3474 = vpow2.f32 %v342_v46  ;;  %v977_v47 = vpop.f32.mrb[24].mxu1 }
 0x46b   :  { %v3869_v48 = vadd.f32 %v977_v47, %v3828_v5  ;;  %v3198_v49 = vpop.f32.mrb[25].mxu1 }
 0x46c   :  { %v980_v50 = vpop.f32.mrb[26].mxu1 }
 0x46d   :  { %v3199_v51 = vpop.f32.mrb[27].mxu1  ;;  %v983_v52 = vsel %vm291_vm3, %v3869_v48, -inf }
 0x46e   :  { %984 = vmax.xlane.f32.xlu1 %v983_v52 }
 0x472   :  { %v1108_v53 = vpop.f32.mrb[28].mxu1 }
 0x473   :  { %v3874_v54 = vadd.f32 %v1108_v53, %v3828_v5  ;;  %v3210_v55 = vpop.f32.mrb[29].mxu1 }
 0x474   :  { %v3876_v56 = vpop.eup %3474  ;;  %v1111_v57 = vpop.f32.mrb[30].mxu1 }
 0x475   :  { %v3211_v58 = vpop.f32.mrb[31].mxu1  ;;  %v1114_v59 = vsel %vm291_vm3, %v3874_v54, -inf  ;;  %v347_v60 = vpack.c.bf16 %v3876_v56, %v3876_v56 }
 0x476   :  { %1115 = vmax.xlane.f32.xlu0 %v1114_v59 }
 0x477   :  { %3143 = vmatmul.mubr.msk.bf16.vlgmr.msra.gmra.mrb[8].mxu0 %vm291_vm3, %v347_v60 }
 0x478   :  { %3153 = vmatpush3.bf16.msra.mxu0 %v478_v61  ;;  %3154 = vmatprep.mubr.msk.bf16.mxu0 %vm3571_vm0, %v3570_v1  ;;  %v3449_v61 = vld [vmem:[#allocation2 + $0x8] ss:$0 sps:$4 sm:$0xff]  }
 0x479   :  { %3164 = vmatprep.subr.bf16.mxu0 %v3570_v1 }
 0x47a   :  { %v1239_v62 = vpop.f32.mrb[32].mxu1 }
 0x47b   :  { %v3888_v63 = vadd.f32 %v1239_v62, %v3828_v5  ;;  %v3222_v0 = vpop.f32.mrb[33].mxu1 }
 0x47c   :  { %v1242_v2 = vpop.f32.mrb[34].mxu1 }
 0x47d   :  { %v3223_v3 = vpop.f32.mrb[35].mxu1  ;;  %v1245_v4 = vsel %vm291_vm3, %v3888_v63, -inf  ;;  %v3450_v2 = vld [vmem:[#allocation2 + $0x8] ss:$0 sps:$4 sm:$0xff]  }
 0x47e   :  { %1246 = vmax.xlane.f32.xlu1 %v1245_v4 }
 0x482   :  { %v1370_v6 = vpop.f32.mrb[36].mxu1 }
 0x483   :  { %v3893_v8 = vadd.f32 %v1370_v6, %v3828_v5  ;;  %v3234_v9 = vpop.f32.mrb[37].mxu1  ;;  %v604_v6 = vpop.permute.xlu1 %603 }
 0x484   :  { %v1373_v10 = vpop.f32.mrb[38].mxu1  ;;  %v3451_v9 = vld [vmem:[#allocation2 + $0x8] ss:$0 sps:$4 sm:$0xff]  }
 0x485   :  { %v3235_v11 = vpop.f32.mrb[39].mxu1  ;;  %v1376_v12 = vsel %vm291_vm3, %v3893_v8, -inf }
 0x486   :  { %1377 = vmax.xlane.f32.xlu1 %v1376_v12  ;;  %v3452_v11 = vld [vmem:[#allocation2 + $0x8] ss:$0 sps:$4 sm:$0xff]  }
 0x487   :  { %v735_v12 = vpop.permute.xlu1 %734 }
 0x48a   :  { %v1501_v13 = vpop.f32.mrb[40].mxu1 }
 0x48b   :  { %v3246_v15 = vpop.f32.mrb[41].mxu1  ;;  %v3901_v35 = vadd.f32 %v1501_v13, %v3828_v5  ;;  %v3453_v13 = vld [vmem:[#allocation2 + $0x8] ss:$0 sps:$4 sm:$0xff]  }
 0x48c   :  { %v1504_v16 = vpop.f32.mrb[42].mxu1  ;;  %1258 = vrot.lane.b32.xlu0 %v3446_v14, %s3577_s14  ;;  %v3454_v14 = vld [vmem:[#allocation2 + $0x8] ss:$0 sps:$4 sm:$0xff]  }
 0x48d   :  { %v3247_v17 = vpop.f32.mrb[43].mxu1  ;;  %v1507_v42 = vsel %vm291_vm3, %v3901_v35, -inf }
 0x490   :  { %1389 = vrot.lane.b32.xlu0 %v3447_v18, %s3579_s1  ;;  %v3455_v18 = vld [vmem:[#allocation2 + $0x8] ss:$0 sps:$4 sm:$0xff]  }
 0x492   :  { %v1632_v20 = vpop.f32.mrb[44].mxu1 }
 0x493   :  { %v3258_v21 = vpop.f32.mrb[45].mxu1  ;;  %v3906_v47 = vadd.f32 %v1632_v20, %v3828_v5 }
 0x494   :  { %v1635_v22 = vpop.f32.mrb[46].mxu1 }
 0x495   :  { %v3259_v23 = vpop.f32.mrb[47].mxu1  ;;  %v1638_v51 = vsel %vm291_vm3, %v3906_v47, -inf }
 0x497   :  { %1127 = vrot.lane.b32.xlu1 %v3448_v24, %s3576_s5 }
 0x49a   :  { %v1763_v26 = vpop.f32.mrb[48].mxu1 }
 0x49b   :  { %v3270_v27 = vpop.f32.mrb[49].mxu1  ;;  %v3909_v49 = vadd.f32 %v1763_v26, %v3828_v5 }
 0x49c   :  { %v1766_v28 = vpop.f32.mrb[50].mxu1 }
 0x49d   :  { %v3271_v29 = vpop.f32.mrb[51].mxu1  ;;  %v1769_v58 = vsel %vm291_vm3, %v3909_v49, -inf  ;;  %v609_v28 = vsel %vm351_vm2, %v604_v6, 0 }
 0x4a2   :  { %v1894_v30 = vpop.f32.mrb[52].mxu1 }
 0x4a3   :  { %v3282_v31 = vpop.f32.mrb[53].mxu1  ;;  %v3914_v57 = vadd.f32 %v1894_v30, %v3828_v5 }
 0x4a4   :  { %v1897_v33 = vpop.f32.mrb[54].mxu1 }
 0x4a5   :  { %v3283_v34 = vpop.f32.mrb[55].mxu1  ;;  %v1900_v60 = vsel %vm291_vm3, %v3914_v57, -inf  ;;  %v740_v33 = vsel %vm351_vm2, %v735_v12, 0 }
 0x4aa   :  { %v2025_v36 = vpop.f32.mrb[56].mxu1 }
 0x4ab   :  { %v3294_v38 = vpop.f32.mrb[57].mxu1  ;;  %v3919_v59 = vadd.f32 %v2025_v36, %v3828_v5 }
 0x4ac   :  { %v2028_v40 = vpop.f32.mrb[58].mxu1 }
 0x4ad   :  { %v3295_v41 = vpop.f32.mrb[59].mxu1  ;;  %v2031_v0 = vsel %vm291_vm3, %v3919_v59, -inf }
 0x4af   :  { %1508 = vmax.xlane.f32.xlu0 %v1507_v42  ;;  %v871_v42 = vsel %vm351_vm2, %v3861_v37, 0 }
 0x4b2   :  { %v2156_v43 = vpop.f32.mrb[60].mxu1 }
 0x4b3   :  { %v3306_v44 = vpop.f32.mrb[61].mxu1  ;;  %v3925_v62 = vadd.f32 %v2156_v43, %v3828_v5 }
 0x4b4   :  { %v2159_v45 = vpop.f32.mrb[62].mxu1 }
 0x4b5   :  { %v3307_v46 = vpop.f32.mrb[63].mxu1  ;;  %v2162_v4 = vsel %vm291_vm3, %v3925_v62, -inf }
 0x4ba   :  { %v2287_v50 = vpop.f32.mrb[64].mxu1 }
 0x4bb   :  { %v3318_v52 = vpop.f32.mrb[65].mxu1  ;;  %1639 = vmax.xlane.f32.xlu1 %v1638_v51  ;;  %v3931_v3 = vadd.f32 %v2287_v50, %v3828_v5  ;;  %v997_v5 = vpop.permute.xlu1 %996 }
 0x4bc   :  { %v2290_v53 = vpop.f32.mrb[66].mxu1  ;;  %v1002_v37 = vsel %vm351_vm2, %v997_v5, 0 }
 0x4bd   :  { %v3319_v55 = vpop.f32.mrb[67].mxu1  ;;  %v2293_v10 = vsel %vm291_vm3, %v3931_v3, -inf }
 0x4bf   :  { %1770 = vmax.xlane.f32.xlu1 %v1769_v58 }
 0x4c3   :  { %1901 = vmax.xlane.f32.xlu1 %v1900_v60 }
 0x4c5   :  { %1520 = vrot.lane.b32.xlu0 %v3449_v61, %s3580_s15 }
 0x4c7   :  { %2032 = vmax.xlane.f32.xlu1 %v2031_v0 }
 0x4c9   :  { %1651 = vrot.lane.b32.xlu0 %v3450_v2, %s3582_s17 }
 0x4cb   :  { %2163 = vmax.xlane.f32.xlu1 %v2162_v4 }
 0x4cd   :  { %1782 = vrot.lane.b32.xlu0 %v3451_v9, %s3583_s18 }
 0x4cf   :  { %2294 = vmax.xlane.f32.xlu1 %v2293_v10 }
 0x4d1   :  { %1913 = vrot.lane.b32.xlu0 %v3452_v11, %s3584_s19 }
 0x4d5   :  { %2175 = vrot.lane.b32.xlu0 %v3453_v13, %s3586_s21 }
 0x4d9   :  { %2306 = vrot.lane.b32.xlu0 %v3454_v14, %s3587_s22 }
 0x4db   :  { %v461_v15 = vpop.xlane.xlu1 %460 }
 0x4dc   :  { %v462_v16 = vsub.f32 %v3847_v19, %v461_v15 }
 0x4de   :  { %v463_v17 = vmul.f32 1.442695, %v462_v16 }
 0x4e0   :  { %3476 = vpow2.f32 %v463_v17  ;;  %2044 = vrot.lane.b32.xlu1 %v3455_v18, %s3585_s20 }
 0x4e3   :  { %v592_v20 = vpop.xlane.xlu0 %591 }
 0x4e4   :  { %v593_v21 = vsub.f32 %v3852_v25, %v592_v20 }
 0x4e6   :  { %v594_v22 = vmul.f32 1.442695, %v593_v21 }
 0x4e8   :  { %3478 = vpow2.f32 %v594_v22 }
 0x4ea   :  { %v3477_v23 = vpop.eup %3476 }
 0x4eb   :  { %v723_v24 = vpop.xlane.xlu0 %722  ;;  %v468_v26 = vpack.c.bf16 %v3477_v23, %v3477_v23  ;;  %v465_v34 = vsel %vm291_vm3, %v3477_v23, 0.0 }
 0x4ec   :  { %v724_v27 = vsub.f32 %v3857_v32, %v723_v24 }
 0x4ed   :  { %3155 = vmatmul.mubr.msk.bf16.vlgmr.msra.gmra.mrb[12].mxu0 %vm291_vm3, %v468_v26 }
 0x4ee   :  { %v725_v19 = vmul.f32 1.442695, %v724_v27  ;;  %3165 = vmatpush3.bf16.msra.mxu0 %v609_v28  ;;  %3166 = vmatprep.mubr.msk.bf16.mxu0 %vm3571_vm0, %v3570_v1 }
 0x4ef   :  { %3176 = vmatprep.subr.bf16.mxu0 %v3570_v1 }
 0x4f0   :  { %3480 = vpow2.f32 %v725_v19 }
 0x4f2   :  { %v3479_v25 = vpop.eup %3478 }
 0x4f3   :  { %v854_v29 = vpop.xlane.xlu1 %853  ;;  %v599_v30 = vpack.c.bf16 %v3479_v25, %v3479_v25  ;;  %v596_v46 = vsel %vm291_vm3, %v3479_v25, 0.0 }
 0x4f4   :  { %v855_v31 = vsub.f32 %v3864_v39, %v854_v29 }
 0x4f5   :  { %3167 = vmatmul.mubr.msk.bf16.vlgmr.msra.gmra.mrb[16].mxu0 %vm291_vm3, %v599_v30 }
 0x4f6   :  { %v856_v32 = vmul.f32 1.442695, %v855_v31  ;;  %3177 = vmatpush3.bf16.msra.mxu0 %v740_v33  ;;  %3178 = vmatprep.mubr.msk.bf16.mxu0 %vm3571_vm0, %v3570_v1 }
 0x4f7   :  { %3188 = vmatprep.subr.bf16.mxu0 %v3570_v1 }
 0x4f8   :  { %3482 = vpow2.f32 %v856_v32  ;;  %466 = vadd.xlane.f32.xlu0 %v465_v34 }
 0x4fa   :  { %v3481_v36 = vpop.eup %3480 }
 0x4fb   :  { %v985_v38 = vpop.xlane.xlu1 %984  ;;  %v727_v40 = vsel %vm291_vm3, %v3481_v36, 0.0  ;;  %v730_v39 = vpack.c.bf16 %v3481_v36, %v3481_v36 }
 0x4fc   :  { %v986_v41 = vsub.f32 %v3869_v48, %v985_v38  ;;  %728 = vadd.xlane.f32.xlu0 %v727_v40 }
 0x4fd   :  { %3179 = vmatmul.mubr.msk.bf16.vlgmr.msra.gmra.mrb[20].mxu0 %vm291_vm3, %v730_v39 }
 0x4fe   :  { %v987_v43 = vmul.f32 1.442695, %v986_v41  ;;  %3189 = vmatpush3.bf16.msra.mxu0 %v871_v42  ;;  %3190 = vmatprep.mubr.msk.bf16.mxu0 %vm3571_vm0, %v3570_v1 }
 0x4ff   :  { %3200 = vmatprep.subr.bf16.mxu0 %v3570_v1 }
 0x500   :  { %3484 = vpow2.f32 %v987_v43 }
 0x502   :  { %v3483_v44 = vpop.eup %3482 }
 0x503   :  { %v1116_v45 = vpop.xlane.xlu0 %1115  ;;  %v858_v48 = vsel %vm291_vm3, %v3483_v44, 0.0  ;;  %v861_v50 = vpack.c.bf16 %v3483_v44, %v3483_v44 }
 0x504   :  { %v1117_v51 = vsub.f32 %v3874_v54, %v1116_v45  ;;  %597 = vadd.xlane.f32.xlu1 %v596_v46  ;;  %859 = vadd.xlane.f32.xlu0 %v858_v48 }
 0x505   :  { %3191 = vmatmul.mubr.msk.bf16.vlgmr.msra.gmra.mrb[24].mxu0 %vm291_vm3, %v861_v50 }
 0x506   :  { %v1118_v52 = vmul.f32 1.442695, %v1117_v51  ;;  %3201 = vmatpush3.bf16.msra.mxu0 %v1002_v37  ;;  %3202 = vmatprep.mubr.msk.bf16.mxu0 %vm3571_vm0, %v3570_v1 }
 0x507   :  { %3212 = vmatprep.subr.bf16.mxu0 %v3570_v1  ;;  %v1259_v11 = vpop.permute.xlu0 %1258 }
 0x508   :  { %3486 = vpow2.f32 %v1118_v52  ;;  %v1264_v14 = vsel %vm351_vm2, %v1259_v11, 0 }
 0x50a   :  { %v3485_v53 = vpop.eup %3484 }
 0x50b   :  { %v1247_v55 = vpop.xlane.xlu1 %1246  ;;  %v989_v58 = vsel %vm291_vm3, %v3485_v53, 0.0  ;;  %v992_v60 = vpack.c.bf16 %v3485_v53, %v3485_v53 }
 0x50c   :  { %v1248_v54 = vsub.f32 %v3888_v63, %v1247_v55  ;;  %990 = vadd.xlane.f32.xlu0 %v989_v58 }
 0x50d   :  { %3203 = vmatmul.mubr.msk.bf16.vlgmr.msra.gmra.mrb[28].mxu0 %vm291_vm3, %v992_v60 }
 0x50e   :  { %v1249_v61 = vmul.f32 1.442695, %v1248_v54  ;;  %3214 = vmatprep.mubr.msk.bf16.mxu0 %vm3571_vm0, %v3570_v1 }
 0x510   :  { %3488 = vpow2.f32 %v1249_v61 }
 0x512   :  { %v3487_v0 = vpop.eup %3486 }
 0x513   :  { %v1378_v2 = vpop.xlane.xlu1 %1377  ;;  %v1120_v4 = vsel %vm291_vm3, %v3487_v0, 0.0  ;;  %v1123_v13 = vpack.c.bf16 %v3487_v0, %v3487_v0 }
 0x514   :  { %v1379_v6 = vsub.f32 %v3893_v8, %v1378_v2  ;;  %1121 = vadd.xlane.f32.xlu1 %v1120_v4  ;;  %v1390_v8 = vpop.permute.xlu0 %1389 }
 0x515   :  { %v1395_v18 = vsel %vm351_vm2, %v1390_v8, 0 }
 0x516   :  { %v1380_v9 = vmul.f32 1.442695, %v1379_v6 }
 0x517   :  { %v1128_v10 = vpop.permute.xlu1 %1127 }
 0x518   :  { %3490 = vpow2.f32 %v1380_v9  ;;  %v1133_v63 = vsel %vm351_vm2, %v1128_v10, 0 }
 0x519   :  { %3213 = vmatpush3.bf16.msra.mxu0 %v1133_v63 }
 0x51a   :  { %v3489_v12 = vpop.eup %3488  ;;  %3224 = vmatprep.subr.bf16.mxu0 %v3570_v1 }
 0x51b   :  { %v1251_v5 = vsel %vm291_vm3, %v3489_v12, 0.0  ;;  %v1254_v16 = vpack.c.bf16 %v3489_v12, %v3489_v12 }
 0x51c   :  { %1252 = vadd.xlane.f32.xlu0 %v1251_v5  ;;  %3215 = vmatmul.mubr.msk.bf16.vlgmr.msra.gmra.mrb[32].mxu0 %vm291_vm3, %v1123_v13  ;;  %v344_v13 = vsel %vm291_vm3, %v3876_v56, 0.0 }
 0x51d   :  { %3225 = vmatpush3.bf16.msra.mxu0 %v1264_v14  ;;  %3226 = vmatprep.mubr.msk.bf16.mxu0 %vm3571_vm0, %v3570_v1 }
 0x51e   :  { %3236 = vmatprep.subr.bf16.mxu0 %v3570_v1 }
 0x522   :  { %v3491_v15 = vpop.eup %3490 }
 0x523   :  { %v1382_v17 = vsel %vm291_vm3, %v3491_v15, 0.0  ;;  %v1385_v20 = vpack.c.bf16 %v3491_v15, %v3491_v15 }
 0x524   :  { %1383 = vadd.xlane.f32.xlu1 %v1382_v17  ;;  %3227 = vmatmul.mubr.msk.bf16.vlgmr.msra.gmra.mrb[36].mxu0 %vm291_vm3, %v1254_v16 }
 0x525   :  { %3237 = vmatpush3.bf16.msra.mxu0 %v1395_v18  ;;  %3238 = vmatprep.mubr.msk.bf16.mxu0 %vm3571_vm0, %v3570_v1 }
 0x526   :  { %3248 = vmatprep.subr.bf16.mxu0 %v3570_v1 }
 0x52c   :  { %3239 = vmatmul.mubr.msk.bf16.vlgmr.msra.gmra.mrb[40].mxu0 %vm291_vm3, %v1385_v20 }
 0x52d   :  { %3250 = vmatprep.mubr.msk.bf16.mxu0 %vm3571_vm0, %v3570_v1 }
 0x53c   :  { %v1509_v21 = vpop.xlane.xlu0 %1508 }
 0x53d   :  { %v1510_v22 = vsub.f32 %v3901_v35, %v1509_v21 }
 0x53f   :  { %v1511_v23 = vmul.f32 1.442695, %v1510_v22 }
 0x540   :  { %v1521_v24 = vpop.permute.xlu0 %1520 }
 0x541   :  { %3492 = vpow2.f32 %v1511_v23  ;;  %v1526_v26 = vsel %vm351_vm2, %v1521_v24, 0 }
 0x542   :  { %3249 = vmatpush3.bf16.msra.mxu0 %v1526_v26 }
 0x543   :  { %3260 = vmatprep.subr.bf16.mxu0 %v3570_v1 }
 0x544   :  { %v1652_v29 = vpop.permute.xlu0 %1651 }
 0x545   :  { %v1657_v38 = vsel %vm351_vm2, %v1652_v29, 0 }
 0x548   :  { %v1640_v27 = vpop.xlane.xlu1 %1639  ;;  %v1783_v45 = vpop.permute.xlu0 %1782 }
 0x549   :  { %v1641_v28 = vsub.f32 %v3906_v47, %v1640_v27  ;;  %v1788_v52 = vsel %vm351_vm2, %v1783_v45, 0 }
 0x54a   :  { %v4001_v19 = vpop.f32.mrb[8].mxu0 }
 0x54b   :  { %v3493_v25 = vpop.eup %3492  ;;  %v1642_v30 = vmul.f32 1.442695, %v1641_v28  ;;  %v3144_v31 = vpop.f32.mrb[9].mxu0 }
 0x54c   :  { %v1771_v33 = vpop.xlane.xlu1 %1770  ;;  %v1513_v35 = vsel %vm291_vm3, %v3493_v25, 0.0  ;;  %v1516_v32 = vpack.c.bf16 %v3493_v25, %v3493_v25  ;;  %v392_v36 = vpop.f32.mrb[10].mxu0 }
 0x54d   :  { %3494 = vpow2.f32 %v1642_v30  ;;  %v1772_v34 = vsub.f32 %v3909_v49, %v1771_v33  ;;  %1514 = vadd.xlane.f32.xlu0 %v1513_v35  ;;  %v3145_v40 = vpop.f32.mrb[11].mxu0  ;;  %v1914_v60 = vpop.permute.xlu0 %1913 }
 0x54e   :  { %3251 = vmatmul.mubr.msk.bf16.vlgmr.msra.gmra.mrb[44].mxu0 %vm291_vm3, %v1516_v32  ;;  %v1919_v2 = vsel %vm351_vm2, %v1914_v60, 0 }
 0x54f   :  { %v1773_v47 = vmul.f32 1.442695, %v1772_v34  ;;  %3261 = vmatpush3.bf16.msra.mxu0 %v1657_v38  ;;  %3262 = vmatprep.mubr.msk.bf16.mxu0 %vm3571_vm0, %v3570_v1 }
 0x550   :  { %v1902_v39 = vpop.xlane.xlu1 %1901  ;;  %3272 = vmatprep.subr.bf16.mxu0 %v3570_v1 }
 0x551   :  { %3496 = vpow2.f32 %v1773_v47  ;;  %v1903_v41 = vsub.f32 %v3914_v57, %v1902_v39  ;;  %v2176_v14 = vpop.permute.xlu0 %2175 }
 0x552   :  { %v2181_v15 = vsel %vm351_vm2, %v2176_v14, 0 }
 0x553   :  { %v1904_v42 = vmul.f32 1.442695, %v1903_v41 }
 0x554   :  { %v2033_v49 = vpop.xlane.xlu1 %2032 }
 0x555   :  { %3498 = vpow2.f32 %v1904_v42  ;;  %v2034_v43 = vsub.f32 %v3919_v59, %v2033_v49  ;;  %v2307_v16 = vpop.permute.xlu0 %2306 }
 0x556   :  { %v2312_v17 = vsel %vm351_vm2, %v2307_v16, 0 }
 0x557   :  { %v3495_v44 = vpop.eup %3494  ;;  %v2035_v46 = vmul.f32 1.442695, %v2034_v43 }
 0x558   :  { %v2164_v48 = vpop.xlane.xlu1 %2163  ;;  %v1644_v50 = vsel %vm291_vm3, %v3495_v44, 0.0  ;;  %v1647_v51 = vpack.c.bf16 %v3495_v44, %v3495_v44 }
 0x559   :  { %3500 = vpow2.f32 %v2035_v46  ;;  %v2165_v37 = vsub.f32 %v3925_v62, %v2164_v48  ;;  %1645 = vadd.xlane.f32.xlu1 %v1644_v50 }
 0x55a   :  { %3263 = vmatmul.mubr.msk.bf16.vlgmr.msra.gmra.mrb[48].mxu0 %vm291_vm3, %v1647_v51 }
 0x55b   :  { %v3497_v57 = vpop.eup %3496  ;;  %v2166_v53 = vmul.f32 1.442695, %v2165_v37  ;;  %3273 = vmatpush3.bf16.msra.mxu0 %v1788_v52  ;;  %3274 = vmatprep.mubr.msk.bf16.mxu0 %vm3571_vm0, %v3570_v1 }
 0x55c   :  { %v2295_v59 = vpop.xlane.xlu1 %2294  ;;  %v1775_v55 = vsel %vm291_vm3, %v3497_v57, 0.0  ;;  %3284 = vmatprep.subr.bf16.mxu0 %v3570_v1  ;;  %v1778_v0 = vpack.c.bf16 %v3497_v57, %v3497_v57 }
 0x55d   :  { %3502 = vpow2.f32 %v2166_v53  ;;  %v2296_v58 = vsub.f32 %v3931_v3, %v2295_v59  ;;  %1776 = vadd.xlane.f32.xlu0 %v1775_v55 }
 0x55f   :  { %v3499_v62 = vpop.eup %3498  ;;  %v2297_v54 = vmul.f32 1.442695, %v2296_v58 }
 0x560   :  { %v1906_v61 = vsel %vm291_vm3, %v3499_v62, 0.0  ;;  %v2045_v9 = vpop.permute.xlu1 %2044  ;;  %v1909_v63 = vpack.c.bf16 %v3499_v62, %v3499_v62 }
 0x561   :  { %3504 = vpow2.f32 %v2297_v54  ;;  %1907 = vadd.xlane.f32.xlu1 %v1906_v61  ;;  %v2050_v11 = vsel %vm351_vm2, %v2045_v9, 0  ;;  %vm1839_vm2 = vcmask 782016  }
 0x562   :  { %3275 = vmatmul.mubr.msk.bf16.vlgmr.msra.gmra.mrb[52].mxu0 %vm291_vm3, %v1778_v0 }
 0x563   :  { %v3501_v4 = vpop.eup %3500  ;;  %3285 = vmatpush3.bf16.msra.mxu0 %v1919_v2  ;;  %3286 = vmatprep.mubr.msk.bf16.mxu0 %vm3571_vm0, %v3570_v1 }
 0x564   :  { %v2037_v3 = vsel %vm291_vm3, %v3501_v4, 0.0  ;;  %3296 = vmatprep.subr.bf16.mxu0 %v3570_v1  ;;  %v2040_v8 = vpack.c.bf16 %v3501_v4, %v3501_v4 }
 0x565   :  { %2038 = vadd.xlane.f32.xlu0 %v2037_v3 }
 0x567   :  { %v3503_v6 = vpop.eup %3502 }
 0x568   :  { %v2168_v10 = vsel %vm291_vm3, %v3503_v6, 0.0  ;;  %v2171_v56 = vpack.c.bf16 %v3503_v6, %v3503_v6 }
 0x569   :  { %2169 = vadd.xlane.f32.xlu1 %v2168_v10 }
 0x56a   :  { %3287 = vmatmul.mubr.msk.bf16.vlgmr.msra.gmra.mrb[56].mxu0 %vm291_vm3, %v1909_v63 }
 0x56b   :  { %v3505_v12 = vpop.eup %3504  ;;  %3297 = vmatpush3.bf16.msra.mxu0 %v2050_v11  ;;  %3298 = vmatprep.mubr.msk.bf16.mxu0 %vm3571_vm0, %v3570_v1 }
 0x56c   :  { %v2299_v5 = vsel %vm291_vm3, %v3505_v12, 0.0  ;;  %3308 = vmatprep.subr.bf16.mxu0 %v3570_v1  ;;  %v2302_v18 = vpack.c.bf16 %v3505_v12, %v3505_v12 }
 0x56d   :  { %345 = vadd.xlane.f32.xlu1 %v344_v13  ;;  %2300 = vadd.xlane.f32.xlu0 %v2299_v5 }
 0x572   :  { %3299 = vmatmul.mubr.msk.bf16.vlgmr.msra.gmra.mrb[60].mxu0 %vm291_vm3, %v2040_v8 }
 0x573   :  { %3309 = vmatpush3.bf16.msra.mxu0 %v2181_v15  ;;  %3310 = vmatprep.mubr.msk.bf16.mxu0 %vm3571_vm0, %v3570_v1 }
 0x574   :  { %3320 = vmatprep.subr.bf16.mxu0 %v3570_v1 }
 0x57a   :  { %3311 = vmatmul.mubr.msk.bf16.vlgmr.msra.gmra.mrb[64].mxu0 %vm291_vm3, %v2171_v56 }
 0x57b   :  { %3321 = vmatpush3.bf16.msra.mxu0 %v2312_v17  ;;  %3322 = vmatprep.mubr.msk.bf16.mxu0 %vm3571_vm0, %v3570_v1 }
 0x57c   :  { %3346 = vmatprep.subr.bf16.mxu0 %v3570_v1 }
 0x582   :  { %3323 = vmatmul.mubr.msk.bf16.vlgmr.msra.gmra.mrb[68].mxu0 %vm291_vm3, %v2302_v18 }
 0x583   :  { %3350 = vmatprep.mubr.msk.bf16.mxu0 %vm3571_vm0, %v3570_v1 }
 0x585   :  { %v467_v20 = vpop.xlane.xlu0 %466 }
 0x586   :  { %3506 = vrcp.f32 %v467_v20 }
 0x589   :  { %v729_v28 = vpop.xlane.xlu0 %728 }
 0x590   :  { %v3507_v22 = vpop.eup %3506 }
 0x591   :  { %v598_v21 = vpop.xlane.xlu1 %597  ;;  %v860_v34 = vpop.xlane.xlu0 %859 }
 0x592   :  { %3508 = vrcp.f32 %v598_v21 }
 0x593   :  { %3510 = vrcp.f32 %v729_v28 }
 0x594   :  { %3512 = vrcp.f32 %v860_v34 }
 0x599   :  { %v991_v49 = vpop.xlane.xlu0 %990 }
 0x59a   :  { %3514 = vrcp.f32 %v991_v49 }
 0x59c   :  { %v3509_v30 = vpop.eup %3508 }
 0x59d   :  { %v3511_v40 = vpop.eup %3510 }
 0x59e   :  { %v3513_v45 = vpop.eup %3512 }
 0x5a1   :  { %v1122_v58 = vpop.xlane.xlu1 %1121 }
 0x5a2   :  { %3516 = vrcp.f32 %v1122_v58 }
 0x5a4   :  { %v3515_v57 = vpop.eup %3514 }
 0x5a9   :  { %v1253_v61 = vpop.xlane.xlu0 %1252 }
 0x5aa   :  { %3518 = vrcp.f32 %v1253_v61 }
 0x5ac   :  { %v3517_v4 = vpop.eup %3516 }
 0x5b1   :  { %v1384_v0 = vpop.xlane.xlu1 %1383 }
 0x5b2   :  { %3520 = vrcp.f32 %v1384_v0 }
 0x5b4   :  { %v3519_v5 = vpop.eup %3518 }
 0x5bc   :  { %v3521_v20 = vpop.eup %3520 }
 0x5c0   :  { %v514_v23 = vpop.f32.mrb[12].mxu0 }
 0x5c1   :  { %v521_v24 = vmul.f32 %v3507_v22, %v514_v23  ;;  %v3156_v26 = vpop.f32.mrb[13].mxu0 }
 0x5c2   :  { %v517_v27 = vpop.f32.mrb[14].mxu0 }
 0x5c3   :  { %v3011_v25 = vpack.c.bf16 %v521_v24, %v521_v24  ;;  %v3157_v29 = vpop.f32.mrb[15].mxu0 }
 0x5c5   :  { %526 = vrot.lane.b32.xlu0 %v3011_v25, %s3587_s22 }
 0x5c8   :  { %v645_v31 = vpop.f32.mrb[16].mxu0 }
 0x5c9   :  { %v652_v33 = vmul.f32 %v3509_v30, %v645_v31  ;;  %v3168_v35 = vpop.f32.mrb[17].mxu0 }
 0x5ca   :  { %v648_v32 = vpop.f32.mrb[18].mxu0 }
 0x5cb   :  { %v3012_v36 = vpack.c.bf16 %v652_v33, %v652_v33  ;;  %v3169_v38 = vpop.f32.mrb[19].mxu0 }
 0x5cd   :  { %657 = vrot.lane.b32.xlu1 %v3012_v36, %s3586_s21 }
 0x5d0   :  { %v776_v47 = vpop.f32.mrb[20].mxu0 }
 0x5d1   :  { %v783_v39 = vmul.f32 %v3511_v40, %v776_v47  ;;  %v3180_v41 = vpop.f32.mrb[21].mxu0 }
 0x5d2   :  { %v779_v42 = vpop.f32.mrb[22].mxu0 }
 0x5d3   :  { %v3013_v43 = vpack.c.bf16 %v783_v39, %v783_v39  ;;  %v3181_v44 = vpop.f32.mrb[23].mxu0 }
 0x5d5   :  { %788 = vrot.lane.b32.xlu1 %v3013_v43, %s3585_s20 }
 0x5d8   :  { %v907_v46 = vpop.f32.mrb[24].mxu0 }
 0x5d9   :  { %v914_v48 = vmul.f32 %v3513_v45, %v907_v46  ;;  %v3192_v50 = vpop.f32.mrb[25].mxu0 }
 0x5da   :  { %v910_v51 = vpop.f32.mrb[26].mxu0  ;;  %v1515_v30 = vpop.xlane.xlu0 %1514  ;;  %v3456_v50 = vld [vmem:[%s4196_s7] sm:$0xff]  }
 0x5db   :  { %v3014_v37 = vpack.c.bf16 %v914_v48, %v914_v48  ;;  %v3193_v52 = vpop.f32.mrb[27].mxu0  ;;  %3327 = vmatpush3.bf16.msra.mxu1 %v3456_v50 }
 0x5dc   :  { %3328 = vmatprep.subr.bf16.mxu1 %v3570_v1 }
 0x5dd   :  { %919 = vrot.lane.b32.xlu0 %v3014_v37, %s3584_s19 }
 0x5e0   :  { %v1038_v53 = vpop.f32.mrb[28].mxu0 }
 0x5e1   :  { %v1045_v59 = vmul.f32 %v3515_v57, %v1038_v53  ;;  %v3204_v55 = vpop.f32.mrb[29].mxu0  ;;  %v3457_v53 = vld [vmem:[%s4196_s7 + $0x8] sm:$0xff]  }
 0x5e2   :  { %v1041_v62 = vpop.f32.mrb[30].mxu0  ;;  %3329 = vmatpush3.bf16.msra.mxu1 %v3457_v53 }
 0x5e3   :  { %v3015_v60 = vpack.c.bf16 %v1045_v59, %v1045_v59  ;;  %v3205_v54 = vpop.f32.mrb[31].mxu0  ;;  %3330 = vmatprep.subr.bf16.mxu1 %v3570_v1 }
 0x5e5   :  { %1050 = vrot.lane.b32.xlu1 %v3015_v60, %s3583_s18  ;;  %v3458_v60 = vld [vmem:[%s4196_s7 + $0x10] sm:$0xff]  }
 0x5e6   :  { %v1646_v2 = vpop.xlane.xlu1 %1645  ;;  %3331 = vmatpush3.bf16.msra.mxu1 %v3458_v60 }
 0x5e7   :  { %3332 = vmatprep.subr.bf16.mxu1 %v3570_v1 }
 0x5ea   :  { %v1777_v40 = vpop.xlane.xlu0 %1776 }
 0x5ee   :  { %v1908_v63 = vpop.xlane.xlu1 %1907 }
 0x5ef   :  { %v1169_v3 = vpop.f32.mrb[32].mxu0 }
 0x5f0   :  { %v1176_v6 = vmul.f32 %v3517_v4, %v1169_v3  ;;  %v3216_v9 = vpop.f32.mrb[33].mxu0  ;;  %v3459_v4 = vld [vmem:[%s4196_s7 + $0x18] sm:$0xff]  }
 0x5f1   :  { %v1172_v10 = vpop.f32.mrb[34].mxu0  ;;  %3333 = vmatpush3.bf16.msra.mxu1 %v3459_v4  ;;  %v2989_v4 = vld [vmem:[%s4193_s4 + $0x4] ss:$0 sm:$0xff] }
 0x5f2   :  { %v3016_v11 = vpack.c.bf16 %v1176_v6, %v1176_v6  ;;  %v3217_v12 = vpop.f32.mrb[35].mxu0  ;;  %v2039_v42 = vpop.xlane.xlu0 %2038  ;;  %3334 = vmatprep.subr.bf16.mxu1 %v3570_v1 }
 0x5f4   :  { %1181 = vrot.lane.b32.xlu0 %v3016_v11, %s3582_s17 }
 0x5f6   :  { %v4056_v13 = vpop.xlane.xlu1 %2169 }
 0x5f7   :  { %v1300_v14 = vpop.f32.mrb[36].mxu0 }
 0x5f8   :  { %v1307_v8 = vmul.f32 %v3519_v5, %v1300_v14  ;;  %v3228_v15 = vpop.f32.mrb[37].mxu0 }
 0x5f9   :  { %v1303_v16 = vpop.f32.mrb[38].mxu0 }
 0x5fa   :  { %v3017_v56 = vpack.c.bf16 %v1307_v8, %v1307_v8  ;;  %v346_v17 = vpop.xlane.xlu1 %345  ;;  %v3229_v18 = vpop.f32.mrb[39].mxu0  ;;  %v3461_v8 = vld [vmem:[%s4196_s7 + $0x28] sm:$0xff]  }
 0x5fb   :  { %3522 = vrcp.f32 %v346_v17  ;;  %v2301_v45 = vpop.xlane.xlu0 %2300  ;;  %v3462_v17 = vld [vmem:[%s4196_s7 + $0x30] sm:$0xff]  }
 0x5fc   :  { %1312 = vrot.lane.b32.xlu1 %v3017_v56, %s3580_s15  ;;  %3524 = vrcp.f32 %v1515_v30 }
 0x5fd   :  { %3526 = vrcp.f32 %v1646_v2 }
 0x5fe   :  { %3528 = vrcp.f32 %v1777_v40 }
 0x5ff   :  { %v1431_v21 = vpop.f32.mrb[40].mxu0  ;;  %3530 = vrcp.f32 %v1908_v63  ;;  %v3460_v63 = vld [vmem:[%s4196_s7 + $0x20] sm:$0xff]  }
 0x600   :  { %v1438_v22 = vmul.f32 %v3521_v20, %v1431_v21  ;;  %v3240_v23 = vpop.f32.mrb[41].mxu0  ;;  %3532 = vrcp.f32 %v2039_v42  ;;  %3335 = vmatpush3.bf16.msra.mxu1 %v3460_v63  ;;  %v3467_v63 = vld [vmem:[%s4199_s10 + $0x8] sm:$0xff]  }
 0x601   :  { %v1434_v24 = vpop.f32.mrb[42].mxu0  ;;  %3534 = vrcp.f32 %v4056_v13  ;;  %3336 = vmatprep.subr.bf16.mxu1 %v3570_v1  ;;  %v3463_v23 = vld [vmem:[%s4196_s7 + $0x38] sm:$0xff]  }
 0x602   :  { %v3018_v26 = vpack.c.bf16 %v1438_v22, %v1438_v22  ;;  %v3241_v27 = vpop.f32.mrb[43].mxu0  ;;  %3536 = vrcp.f32 %v2301_v45 }
 0x604   :  { %1443 = vrot.lane.b32.xlu0 %v3018_v26, %s3579_s1  ;;  %3337 = vmatpush3.bf16.msra.mxu1 %v3461_v8 }
 0x605   :  { %v3523_v28 = vpop.eup %3522  ;;  %3338 = vmatprep.subr.bf16.mxu1 %v3570_v1 }
 0x606   :  { %v396_v25 = vmul.f32 %v3523_v28, %v4001_v19  ;;  %v3525_v31 = vpop.eup %3524 }
 0x607   :  { %v3527_v47 = vpop.eup %3526 }
 0x608   :  { %v397_v29 = vpack.c.bf16 %v396_v25, %v396_v25  ;;  %v3529_v46 = vpop.eup %3528  ;;  %3339 = vmatpush3.bf16.msra.mxu1 %v3462_v17 }
 0x609   :  { %v3531_v58 = vpop.eup %3530  ;;  %3340 = vmatprep.subr.bf16.mxu1 %v3570_v1 }
 0x60a   :  { %399 = vst.msk [vmem:[#allocation3] sm:$0xf] %vm398_vm5, %v397_v29  ;;  %v3533_v9 = vpop.eup %3532  ;;  %vm2101_vm5 = vcmask 913216  }
 0x60b   :  { %v3535_v16 = vpop.eup %3534 }
 0x60c   :  { %3341 = vmatpush3.bf16.msra.mxu1 %v3463_v23  ;;  %v3537_v27 = vpop.eup %3536 }
 0x60d   :  { %3371 = vmatprep.subr.bf16.mxu1 %v3570_v1 }
 0x621   :  { %v1562_v33 = vpop.f32.mrb[44].mxu0 }
 0x622   :  { %v1569_v35 = vmul.f32 %v3525_v31, %v1562_v33  ;;  %v3252_v32 = vpop.f32.mrb[45].mxu0 }
 0x623   :  { %v1565_v34 = vpop.f32.mrb[46].mxu0 }
 0x624   :  { %v3019_v36 = vpack.c.bf16 %v1569_v35, %v1569_v35  ;;  %v3253_v38 = vpop.f32.mrb[47].mxu0 }
 0x626   :  { %1574 = vrot.lane.b32.xlu1 %v3019_v36, %s3577_s14 }
 0x62d   :  { %v1693_v39 = vpop.f32.mrb[48].mxu0 }
 0x62e   :  { %v1700_v19 = vmul.f32 %v3527_v47, %v1693_v39  ;;  %v3264_v41 = vpop.f32.mrb[49].mxu0 }
 0x62f   :  { %v1696_v49 = vpop.f32.mrb[50].mxu0 }
 0x630   :  { %v3020_v43 = vpack.c.bf16 %v1700_v19, %v1700_v19  ;;  %v3265_v44 = vpop.f32.mrb[51].mxu0 }
 0x632   :  { %1705 = vrot.lane.b32.xlu0 %v3020_v43, %s3576_s5  ;;  %v2979_v43 = vld [vmem:[%s4193_s4 + $0x2] ss:$0 sm:$0xff] }
 0x635   :  { %v1824_v48 = vpop.f32.mrb[52].mxu0 }
 0x636   :  { %v1831_v51 = vmul.f32 %v3529_v46, %v1824_v48  ;;  %v3276_v37 = vpop.f32.mrb[53].mxu0 }
 0x637   :  { %v527_v52 = vpop.permute.xlu0 %526  ;;  %v1827_v57 = vpop.f32.mrb[54].mxu0 }
 0x638   :  { %v3021_v59 = vpack.c.bf16 %v1831_v51, %v1831_v51  ;;  %530 = vst.msk [vmem:[#allocation3] sm:$0xf] %vm529_vm6, %v527_v52  ;;  %v3277_v55 = vpop.f32.mrb[55].mxu0  ;;  %vm2232_vm6 = vcmask 978816  }
 0x63a   :  { %1836 = vrot.lane.b32.xlu1 %v3021_v59, %s3575_s30 }
 0x63d   :  { %v1955_v62 = vpop.f32.mrb[56].mxu0 }
 0x63e   :  { %v1962_v54 = vmul.f32 %v3531_v58, %v1955_v62  ;;  %v3288_v61 = vpop.f32.mrb[57].mxu0  ;;  %v3464_v58 = vld [vmem:[%s4197_s8] sm:$0xff]  }
 0x63f   :  { %v658_v0 = vpop.permute.xlu1 %657  ;;  %v1958_v2 = vpop.f32.mrb[58].mxu0  ;;  %3347 = vmatpush3.bf16.msra.mxu0 %v3464_v58 }
 0x640   :  { %v3022_v3 = vpack.c.bf16 %v1962_v54, %v1962_v54  ;;  %661 = vst.msk [vmem:[#allocation3] sm:$0xf] %vm660_vm7, %v658_v0  ;;  %v3289_v6 = vpop.f32.mrb[59].mxu0  ;;  %vm2363_vm7 = vcmask 1044416   ;;  %3348 = vmatprep.subr.bf16.mxu0 %v3570_v1  ;;  %v2988_v0 = vld [vmem:[%s4193_s4 + $0x3] ss:$0 sm:$0xff] }
 0x642   :  { %1967 = vrot.lane.b32.xlu0 %v3022_v3, %s3581_s16 }
 0x645   :  { %v2086_v10 = vpop.f32.mrb[60].mxu0 }
 0x646   :  { %v2093_v11 = vmul.f32 %v3533_v9, %v2086_v10  ;;  %v3300_v12 = vpop.f32.mrb[61].mxu0  ;;  %v3466_v10 = vld [vmem:[%s4199_s10] sm:$0xff]  }
 0x647   :  { %v789_v5 = vpop.permute.xlu1 %788  ;;  %v2089_v14 = vpop.f32.mrb[62].mxu0  ;;  %v3469_v12 = vld [vmem:[%s4199_s10 + $0x18] sm:$0xff]  }
 0x648   :  { %v3023_v13 = vpack.c.bf16 %v2093_v11, %v2093_v11  ;;  %792 = vst.msk [vmem:[#allocation3] sm:$0xf] %vm791_vm8, %v789_v5  ;;  %v3301_v15 = vpop.f32.mrb[63].mxu0  ;;  %v3468_v11 = vld [vmem:[%s4199_s10 + $0x10] sm:$0xff]   ;;  %v2990_v5 = vld [vmem:[%s4198_s9] ss:$0 sm:$0xff] }
 0x64a   :  { %2098 = vrot.lane.b32.xlu1 %v3023_v13, %s3578_s0 }
 0x64d   :  { %v2217_v56 = vpop.f32.mrb[64].mxu0 }
 0x64e   :  { %v2224_v18 = vmul.f32 %v3535_v16, %v2217_v56  ;;  %v3312_v20 = vpop.f32.mrb[65].mxu0 }
 0x64f   :  { %v920_v21 = vpop.permute.xlu0 %919  ;;  %v2220_v22 = vpop.f32.mrb[66].mxu0 }
 0x650   :  { %v3024_v24 = vpack.c.bf16 %v2224_v18, %v2224_v18  ;;  %923 = vst.msk [vmem:[#allocation3] sm:$0xf] %vm922_vm9, %v920_v21  ;;  %v3313_v26 = vpop.f32.mrb[67].mxu0  ;;  %vm2633_vm9 = vcmask 523264  }
 0x652   :  { %2229 = vrot.lane.b32.xlu0 %v3024_v24, %s3573_s28 }
 0x655   :  { %v2348_v28 = vpop.f32.mrb[68].mxu0 }
 0x656   :  { %v2355_v25 = vmul.f32 %v3537_v27, %v2348_v28  ;;  %v3324_v29 = vpop.f32.mrb[69].mxu0 }
 0x657   :  { %v1051_v30 = vpop.permute.xlu1 %1050  ;;  %v2351_v31 = vpop.f32.mrb[70].mxu0 }
 0x658   :  { %v3025_v33 = vpack.c.bf16 %v2355_v25, %v2355_v25  ;;  %1054 = vst.msk [vmem:[#allocation3] sm:$0xf] %vm1053_vm10, %v1051_v30  ;;  %v3325_v35 = vpop.f32.mrb[71].mxu0 }
 0x65a   :  { %2360 = vrot.lane.b32.xlu1 %v3025_v33, %s3574_s29 }
 0x666   :  { %v1182_v32 = vpop.permute.xlu0 %1181 }
 0x667   :  { %1185 = vst.msk [vmem:[#allocation3] sm:$0xf] %vm1184_vm11, %v1182_v32 }
 0x66e   :  { %v1313_v34 = vpop.permute.xlu1 %1312 }
 0x66f   :  { %1316 = vst.msk [vmem:[#allocation3] sm:$0xf] %vm1315_vm12, %v1313_v34 }
 0x676   :  { %v1444_v36 = vpop.permute.xlu0 %1443 }
 0x677   :  { %1447 = vst.msk [vmem:[#allocation3] sm:$0xf] %vm1446_vm13, %v1444_v36 }
 0x698   :  { %v1575_v38 = vpop.permute.xlu1 %1574 }
 0x699   :  { %1578 = vst.msk [vmem:[#allocation3] sm:$0xf] %vm1577_vm14, %v1575_v38 }
 0x6a4   :  { %v1706_v40 = vpop.permute.xlu0 %1705 }
 0x6a5   :  { %1709 = vst.msk [vmem:[#allocation3] sm:$0xf] %vm1708_vm15, %v1706_v40 }
 0x6ac   :  { %v1837_v47 = vpop.permute.xlu1 %1836 }
 0x6ad   :  { %1840 = vst.msk [vmem:[#allocation3] sm:$0xf] %vm1839_vm2, %v1837_v47 }
 0x6b4   :  { %v1968_v39 = vpop.permute.xlu0 %1967 }
 0x6b5   :  { %1971 = vst.msk [vmem:[#allocation3] sm:$0xf] %vm1970_vm4, %v1968_v39 }
 0x6bc   :  { %v2099_v19 = vpop.permute.xlu1 %2098 }
 0x6bd   :  { %2102 = vst.msk [vmem:[#allocation3] sm:$0xf] %vm2101_vm5, %v2099_v19 }
 0x6c4   :  { %v2230_v41 = vpop.permute.xlu0 %2229 }
 0x6c5   :  { %2233 = vst.msk [vmem:[#allocation3] sm:$0xf] %vm2232_vm6, %v2230_v41 }
 0x6cc   :  { %v2361_v42 = vpop.permute.xlu1 %2360 }
 0x6cd   :  { %2364 = vst.msk [vmem:[#allocation3] sm:$0xf] %vm2363_vm7, %v2361_v42  ;;  %v2678_v42 = vlaneseq }
 0x6d4   :  { %v2365_v49 = vld [vmem:[#allocation3] sm:$0xf] }
 0x6d5   :  { %3343 = vmatmul.mubr.bf16.vlgmr.msra.gmra.mrb[68].mxu1 %v2365_v49  ;;  %v2679_v49 = vshrl.u32 %v2678_v42, 7 }
 0x6d6   :  { %3375 = vmatprep.mubr.msk.bf16.mxu1 %vm3571_vm0, %v3570_v1 }
 0x7a8   :  { %v2469_v44 = vpop.f32.mrb[68].mxu1 }
 0x7a9   :  { %v2470_v45 = vadd.f32 %v2979_v43, %v2469_v44  ;;  %v3344_v46 = vpop.f32.mrb[69].mxu1  ;;  %v3000_v43 = vld [vmem:[%s4192_s3] ss:$0 sm:$0xff]  ;;  %v2994_v44 = vld [vmem:[%s4193_s4 + $0x5] ss:$0 sm:$0xff] }
 0x7aa   :  { %v2472_v48 = vpop.f32.mrb[70].mxu1  ;;  %vm2685_vm10 = vcmp.eq.s32.totalorder %v2679_v49, %v3000_v43 }
 0x7ab   :  { %v4107_v50 = vadd.f32 %v2470_v45, %v3680_v7  ;;  %v3345_v51 = vpop.f32.mrb[71].mxu1  ;;  %v3465_v7 = vld [vmem:[%s4197_s8 + $0x8] sm:$0xff]   ;;  %v3001_v45 = vsel %vm2685_vm10, 1.0, %v3570_v1 }
 0x7ac   :  { %3349 = vmatpush3.bf16.msra.mxu0 %v3465_v7 }
 0x7ad   :  { %v2478_v37 = vsel %vm65_vm1, %v4107_v50, 0.0  ;;  %3354 = vmatprep.subr.bf16.mxu0 %v3570_v1 }
 0x7ae   :  { %2479 = vadd.xlane.f32.xlu0 %v2478_v37 }
 0x83b   :  { %v2480_v52 = vpop.xlane.xlu0 %2479 }
 0x83c   :  { %v2481_v57 = vmul.f32 0.03125, %v2480_v52  ;;  %v2688_v52 = vmul.f32 0.25, %v3001_v45 }
 0x83e   :  { %v2482_v53 = vsub.f32 %v4107_v50, %v2481_v57 }
 0x840   :  { %v2483_v59 = vmul.f32 %v2482_v53, %v2482_v53 }
 0x842   :  { %v2484_v55 = vsel %vm65_vm1, %v2483_v59, 0.0 }
 0x843   :  { %2485 = vadd.xlane.f32.xlu1 %v2484_v55 }
 0x8d0   :  { %v2486_v62 = vpop.xlane.xlu1 %2485 }
 0x8d1   :  { %v2487_v60 = vmul.f32 0.03125, %v2486_v62 }
 0x8d3   :  { %v2488_v54 = vadd.f32 1e-05, %v2487_v60 }
 0x8d5   :  { %3538 = vrsqrt.f32 %v2488_v54 }
 0x8df   :  { %v3539_v61 = vpop.eup %3538 }
 0x8e0   :  { %v2490_v2 = vmul.f32 %v3539_v61, %v2482_v53 }
 0x8e2   :  { %v2495_v3 = vmul.f32 %v2988_v0, %v2490_v2  ;;  %v3470_v0 = vld [vmem:[%s4200_s11] sm:$0xff]  }
 0x8e3   :  { %3372 = vmatpush3.bf16.msra.mxu1 %v3470_v0 }
 0x8e4   :  { %v2500_v6 = vadd.f32 %v2989_v4, %v2495_v3  ;;  %3373 = vmatprep.subr.bf16.mxu1 %v3570_v1 }
 0x8e6   :  { %v2501_v9 = vpack.c.bf16 %v2500_v6, %v2500_v6 }
 0x8e8   :  { %3351 = vmatmul.mubr.msk.bf16.vlgmr.msra.gmra.mrb[72].mxu0 %vm65_vm1, %v2501_v9  ;;  %v3003_v9 = vld [vmem:[%s4193_s4 + $0x6] ss:$0 sm:$0xff] }
 0x8e9   :  { %3362 = vmatprep.mubr.msk.bf16.mxu0 %vm3571_vm0, %v3570_v1  ;;  %3355 = vmatpush3.bf16.msra.mxu0 %v3466_v10 }
 0x8ea   :  { %3356 = vmatprep.subr.bf16.mxu0 %v3570_v1 }
 0x8ed   :  { %3357 = vmatpush3.bf16.msra.mxu0 %v3467_v63  ;;  %v3004_v63 = vld [vmem:[%s4193_s4 + $0x7] ss:$0 sm:$0xff]  ;;  %s3546_s4 = scalar_lea.vmem %s2864_s26, 32 }
 0x8ee   :  { %3358 = vmatprep.subr.bf16.mxu0 %v3570_v1  ;;  %p3547_p0 = scmp.ne.s32.totalorder %s2864_s26, %s3546_s4  ;;  %p3552_p2 = scmp.lt.s32.totalorder %s3546_s4, %s3546_s4 }
 0x8f0   :  { %p3553_p3 = por %p3552_p2, %p3551_p1 }
 0x8f1   :  { %3359 = vmatpush3.bf16.msra.mxu0 %v3468_v11 }
 0x8f2   :  { %3360 = vmatprep.subr.bf16.mxu0 %v3570_v1  ;;  %p3554_p4 = pnand %p3553_p3, %p3547_p0 }
 0x8f5   :  { %3361 = vmatpush3.bf16.msra.mxu0 %v3469_v12 }
 0x8f6   :  { %3366 = vmatprep.subr.mxu0 %v3570_v1 }
 0x9bb   :  { %v2562_v14 = vpop.f32.mrb[72].mxu0 }
 0x9bc   :  { %v2563_v8 = vadd.f32 %v2990_v5, %v2562_v14  ;;  %v3352_v13 = vpop.f32.mrb[73].mxu0 }
 0x9bd   :  { %v2565_v15 = vpop.f32.mrb[74].mxu0 }
 0x9be   :  { %v2569_v16 = vmul.f32 0.70710677, %v2563_v8  ;;  %v3353_v56 = vpop.f32.mrb[75].mxu0  ;;  %v2568_v47 = vmul.f32 0.5, %v2563_v8 }
 0x9c0   :  { %v2570_v17 = vand.u32 2147483647, %v2569_v16  ;;  %vm2590_vm8 = vcmp.ge.f32.partialorder %v2569_v16, 0.0 }
 0x9c2   :  { %v2571_v18 = vmul.f32 0.3275911, %v2570_v17  ;;  %v2584_v21 = vsub.f32 0.0, %v2570_v17 }
 0x9c4   :  { %v2572_v20 = vadd.f32 1.0, %v2571_v18  ;;  %v2585_v23 = vmul.f32 %v2584_v21, %v2570_v17 }
 0x9c6   :  { %3540 = vrcp.f32 %v2572_v20  ;;  %v2586_v27 = vmul.f32 1.442695, %v2585_v23 }
 0x9c8   :  { %3542 = vpow2.f32 %v2586_v27 }
 0x9d0   :  { %v3541_v22 = vpop.eup %3540 }
 0x9d1   :  { %v2575_v24 = vmul.f32 1.0614054, %v3541_v22 }
 0x9d2   :  { %v3543_v32 = vpop.eup %3542 }
 0x9d3   :  { %v2576_v26 = vadd.f32 -1.4531521, %v2575_v24 }
 0x9d5   :  { %v2577_v28 = vmul.f32 %v3541_v22, %v2576_v26 }
 0x9d7   :  { %v2578_v25 = vadd.f32 1.4214138, %v2577_v28 }
 0x9d9   :  { %v2579_v29 = vmul.f32 %v3541_v22, %v2578_v25 }
 0x9db   :  { %v2580_v30 = vadd.f32 -0.28449672, %v2579_v29 }
 0x9dd   :  { %v2581_v31 = vmul.f32 %v3541_v22, %v2580_v30 }
 0x9df   :  { %v2582_v33 = vadd.f32 0.2548296, %v2581_v31 }
 0x9e1   :  { %v2583_v35 = vmul.f32 %v3541_v22, %v2582_v33 }
 0x9e3   :  { %v2588_v34 = vmul.f32 %v3543_v32, %v2583_v35 }
 0x9e5   :  { %v2589_v36 = vsub.f32 1.0, %v2588_v34 }
 0x9e7   :  { %v2591_v38 = vsub.f32 0.0, %v2589_v36 }
 0x9e9   :  { %v2592_v40 = vsel %vm2590_vm8, %v2589_v36, %v2591_v38 }
 0x9ea   :  { %v2593_v39 = vadd.f32 1.0, %v2592_v40 }
 0x9ec   :  { %v2594_v19 = vmul.f32 %v2593_v39, %v2568_v47 }
 0x9ee   :  { %v2595_v41 = vpack.c.bf16 %v2594_v19, %v2594_v19 }
 0x9f0   :  { %3363 = vmatmul.mubr.msk.bf16.vlgmr.msra.gmra.mrb[76].mxu0 %vm2633_vm9, %v2595_v41 }
 0x9f1   :  { %3368 = vmatprep.mubr.msk.f32.mxu0 %vm3571_vm0, %v3570_v1  ;;  %vm2764_vm0 = vcmask 254976   ;;  %v3005_v1 = vld [vmem:[%s4201_s12] ss:$0 sm:$0xff] }
 0xac3   :  { %v2671_v46 = vpop.f32.mrb[76].mxu0 }
 0xac4   :  { %v2672_v48 = vadd.f32 %v2994_v44, %v2671_v46  ;;  %v3364_v51 = vpop.f32.mrb[77].mxu0 }
 0xac5   :  { %v2674_v37 = vpop.f32.mrb[78].mxu0 }
 0xac6   :  { %v2677_v57 = vadd.f32 %v2672_v48, %v4107_v50  ;;  %v3365_v53 = vpop.f32.mrb[79].mxu0  ;;  %v3471_v50 = vld [vmem:[%s4200_s11 + $0x8] sm:$0xff]  }
 0xac7   :  { %3374 = vmatpush3.bf16.msra.mxu1 %v3471_v50 }
 0xac8   :  { %3367 = vmatpush3.msra.mxu0 %v2677_v57 }
 0xac9   :  { %3369 = vmatmul.mubr.msk.f32.vlgmr.msra.gmra.mrb[80].mxu0 %vm291_vm3, %v2688_v52  ;;  %vm2855_vm3 = vcmask 123904  }
 0xb9c   :  { %v2758_v59 = vpop.f32.mrb[80].mxu0 }
 0xb9d   :  { %v2765_v55 = vsel %vm2764_vm0, %v2758_v59, 0.0  ;;  %v3370_v58 = vpop.f32.mrb[81].mxu0 }
 0xb9e   :  { %2766 = vadd.xlane.f32.xlu0 %v2765_v55 }
 0xc2b   :  { %v2767_v7 = vpop.xlane.xlu0 %2766 }
 0xc2c   :  { %v2768_v62 = vmul.f32 0.03125, %v2767_v7 }
 0xc2e   :  { %v2769_v60 = vsub.f32 %v2758_v59, %v2768_v62 }
 0xc30   :  { %v2770_v54 = vmul.f32 %v2769_v60, %v2769_v60 }
 0xc32   :  { %v2771_v61 = vsel %vm2764_vm0, %v2770_v54, 0.0 }
 0xc33   :  { %2772 = vadd.xlane.f32.xlu0 %v2771_v61 }
 0xcc0   :  { %v2773_v2 = vpop.xlane.xlu0 %2772 }
 0xcc1   :  { %v2774_v4 = vmul.f32 0.03125, %v2773_v2 }
 0xcc3   :  { %v2775_v3 = vadd.f32 1e-05, %v2774_v4 }
 0xcc5   :  { %3544 = vrsqrt.f32 %v2775_v3 }
 0xccf   :  { %v3545_v6 = vpop.eup %3544 }
 0xcd0   :  { %v2777_v10 = vmul.f32 %v3545_v6, %v2769_v60 }
 0xcd2   :  { %v2782_v11 = vmul.f32 %v3003_v9, %v2777_v10 }
 0xcd4   :  { %v2787_v12 = vadd.f32 %v3004_v63, %v2782_v11 }
 0xcd6   :  { %v2788_v5 = vpack.c.bf16 %v2787_v12, %v2787_v12 }
 0xcd8   :  { %3376 = vmatmul.mubr.msk.bf16.vlgmr.msra.gmra.mrb[72].mxu1 %vm65_vm1, %v2788_v5 }
 0xdab   :  { %v2849_v14 = vpop.f32.mrb[72].mxu1 }
 0xdac   :  { %v2850_v8 = vadd.f32 %v3005_v1, %v2849_v14  ;;  %v3377_v13 = vpop.f32.mrb[73].mxu1 }
 0xdad   :  { %v2852_v15 = vpop.f32.mrb[74].mxu1 }
 0xdae   :  { %v3378_v16 = vpop.f32.mrb[75].mxu1  ;;  %2856 = vst.msk [vmem:[#allocation4] sm:$0x3] %vm2855_vm3, %v2850_v8 }
 0xdaf   :  { %3557 = shalt.err (!%p3554_p4)
}
 0xdb0   :  { %s3558_s12 = scalar_lea.hbm %s4202_s13, 32 }
 0xdb1   :  { %p3559_p5 = scmp.ne.s32.totalorder %s4202_s13, %s3558_s12  ;;  %p3562_p6 = scmp.lt.u32.totalorder %s3558_s12, %s4202_s13 }
 0xdb3   :  { %p3564_p7 = pnand %p3562_p6, %p3559_p5 }
 0xdb5   :  { %3567 = shalt.err (!%p3564_p7)
}
 0xdb6   :  { %2866 = dma.vmem_to_hbm [thread:$0]  %s2864_s26, 32, %s4202_s13, [#allocation5]  }
 0xdb7   :  { %3568 = dma.done.wait [#allocation5], 32  }
 0xdb8   :  { %3569 = vsyncadd [#allocation5], 4294967264 }
 0xdb9   :  { %2870 = vsyncpa [#allocation5], 1 }

</bundles_post_ra>
